<compile_context>
chip_gen: v7x
topology: tpu7x:2x2x1
jax: 0.10.0
libtpu: 0.0.40
codegen_flags: <defaults>
</compile_context>

<pallas_src>
import functools
import math

import jax
import jax.numpy as jnp
from jax.experimental import pallas as pl
from jax.experimental.pallas import tpu as pltpu

LANE = 128


def _round_up(v, m):
    return (v + m - 1) // m * m


# ---------------------------------------------------------------------------
# Pallas kernel: one fused SAGE layer (mean-aggregation + projection [+ReLU])
# ---------------------------------------------------------------------------
def _sage_layer_kernel(a_ref, x_ref, dinv_ref, wl_ref, wr_ref, b_ref, o_ref,
                       acc_ref, *, apply_relu: bool, tm: int, tk: int):
    """grid = (row blocks, K blocks). acc_ref accumulates sum_{j} A_ij x_j in f32.

    x_ref is the full (N_p, Cin) array, VMEM-resident (constant index_map);
    neighbor rows / root rows are sliced in-kernel with pl.ds.
    """
    i = pl.program_id(0)
    k = pl.program_id(1)

    @pl.when(k == 0)
    def _init():
        acc_ref[...] = jnp.zeros_like(acc_ref)

    # neighbor-row slice of the resident x: (tk, Cin) bf16
    xk = x_ref[pl.ds(pl.multiple_of(k * tk, tk), tk), :]
    # int8 count adjacency tile -> bf16 on the VPU, MXU matmul with f32 acc
    a = a_ref[...].astype(xk.dtype)
    acc_ref[...] += jnp.dot(a, xk, preferred_element_type=jnp.float32)

    @pl.when(k == pl.num_programs(1) - 1)
    def _finalize():
        # exact mean: f32 neighbor sum * f32 1/deg (never quantized into A)
        agg = (acc_ref[...] * dinv_ref[...]).astype(x_ref.dtype)   # (tm, Cin)
        xr = x_ref[pl.ds(pl.multiple_of(i * tm, tm), tm), :]       # root rows
        h = (jnp.dot(agg, wl_ref[...], preferred_element_type=jnp.float32)
             + jnp.dot(xr, wr_ref[...], preferred_element_type=jnp.float32)
             + b_ref[...])
        if apply_relu:
            h = jnp.maximum(h, 0.0)
        # TODO(synk): dropout is identity in inference mode (training=False).
        o_ref[...] = h.astype(o_ref.dtype)


def sage_layer(a_mask, x, deg_inv, w_l, w_r, b, *, apply_relu, out_dtype,
               tm, tk):
    n_p = a_mask.shape[0]
    cin = x.shape[1]
    cout = w_l.shape[1]
    assert n_p % tm == 0 and n_p % tk == 0, (n_p, tm, tk)
    kernel = functools.partial(_sage_layer_kernel, apply_relu=apply_relu,
                               tm=tm, tk=tk)
    return pl.pallas_call(
        kernel,
        out_shape=jax.ShapeDtypeStruct((n_p, cout), out_dtype),
        grid_spec=pltpu.PrefetchScalarGridSpec(
            num_scalar_prefetch=0,
            grid=(n_p // tm, n_p // tk),
            in_specs=[
                pl.BlockSpec((tm, tk), lambda i, k: (i, k)),      # int8 A tile
                pl.BlockSpec((n_p, cin), lambda i, k: (0, 0)),    # resident x
                pl.BlockSpec((tm, 1), lambda i, k: (i, 0)),       # 1/deg (f32)
                pl.BlockSpec((cin, cout), lambda i, k: (0, 0)),   # folded W_l
                pl.BlockSpec((cin, cout), lambda i, k: (0, 0)),   # folded W_r
                pl.BlockSpec((1, cout), lambda i, k: (0, 0)),     # folded bias
            ],
            out_specs=pl.BlockSpec((tm, cout), lambda i, k: (i, 0)),
            scratch_shapes=[pltpu.VMEM((tm, cin), jnp.float32)],
        ),
        # NOTE: constant-index operands (x / W / b) could take
        # pipeline_mode=pl.Buffered(1) to save VMEM on v7x when cin/cout or
        # tiles are scaled up; not needed at these sizes.
        compiler_params=pltpu.CompilerParams(
            dimension_semantics=("parallel", "arbitrary"),
            vmem_limit_bytes=48 * 1024 * 1024,
        ),
    )(a_mask, x, deg_inv, w_l, w_r, b)


# ---------------------------------------------------------------------------
# Host-side glue: adjacency, parameter folding, model container
# ---------------------------------------------------------------------------
def build_adjacency(edge_index, num_nodes):
    """counts[i, j] = #edges j -> i (int8), deg_inv[i] = 1/max(in_deg(i), 1)."""
    # TODO(synk): dense O(N^2) adjacency; a CSR + scalar-prefetch gather kernel
    # is the scalable formulation for large graphs. int8 saturates above 127
    # parallel edges between one node pair.
    src = edge_index[0]
    dst = edge_index[1]
    counts = jnp.zeros((num_nodes, num_nodes), jnp.int32).at[dst, src].add(1)
    deg = jnp.sum(counts, axis=1, keepdims=True).astype(jnp.float32)
    deg_inv = 1.0 / jnp.maximum(deg, 1.0)
    return counts.astype(jnp.int8), deg_inv


def _glorot(key, fan_in, fan_out):
    limit = jnp.sqrt(6.0 / (fan_in + fan_out))
    return jax.random.uniform(key, (fan_in, fan_out), jnp.float32, -limit, limit)


def _pad2(w, rows, cols):
    return jnp.zeros((rows, cols), w.dtype).at[:w.shape[0], :w.shape[1]].set(w)


class GraphSAGEPallas:
    def __init__(self, in_channels, hidden_channels, s_channels, num_layers,
                 dropout, return_emb, key, eps=1e-5):
        self.num_layers = num_layers
        self.return_emb = return_emb
        self.dropout = dropout          # identity in inference mode
        self.eps = eps
        self.hidden_channels = hidden_channels
        self.s_channels = s_channels

        keys = jax.random.split(key, 2 * num_layers + 1)

        # Raw (unfolded) parameters — kept for the pure-JAX reference check.
        self.raw_convs = []
        cin = in_channels
        for i in range(num_layers):
            wl = _glorot(keys[2 * i], cin, hidden_channels)      # neighbor weight
            wr = _glorot(keys[2 * i + 1], cin, hidden_channels)  # root weight
            b = jnp.zeros((hidden_channels,), jnp.float32)
            self.raw_convs.append((wl, wr, b))
            cin = hidden_channels

        # eval-mode BatchNorm running stats / affine (fresh-init values).
        self.raw_norms = [
            (jnp.zeros((hidden_channels,), jnp.float32),   # running_mean
             jnp.ones((hidden_channels,), jnp.float32),    # running_var
             jnp.ones((hidden_channels,), jnp.float32),    # gamma
             jnp.zeros((hidden_channels,), jnp.float32))   # beta
            for _ in range(num_layers - 1)
        ]
        # (the extra norm created when return_emb=False is never applied in the
        #  reference forward, so it is not materialized here)

        self.raw_linear_w = None
        if not return_emb:
            self.raw_linear_w = _glorot(keys[-1], hidden_channels, s_channels)

        # ---- host-side folding: BN+bias into weights; last layer + linear ----
        self.layers = []
        for i in range(num_layers):
            wl, wr, b = self.raw_convs[i]
            last = i == num_layers - 1
            if not last:
                mean, var, gamma, beta = self.raw_norms[i]
                scale = gamma / jnp.sqrt(var + eps)
                wl_f = wl * scale[None, :]
                wr_f = wr * scale[None, :]
                b_f = (b - mean) * scale + beta
            elif not return_emb:
                # fuse the final bias-free Linear into the last (linear) layer
                wl_f = wl @ self.raw_linear_w
                wr_f = wr @ self.raw_linear_w
                b_f = b @ self.raw_linear_w
            else:
                wl_f, wr_f, b_f = wl, wr, b
            ci = wl.shape[0]
            co = wl_f.shape[1]
            ci_p = _round_up(ci, LANE)
            co_p = _round_up(co, LANE)
            w_l_pad = _pad2(wl_f, ci_p, co_p).astype(jnp.bfloat16)
            w_r_pad = _pad2(wr_f, ci_p, co_p).astype(jnp.bfloat16)
            b_pad = jnp.zeros((1, co_p), jnp.float32).at[0, :co].set(b_f)
            self.layers.append((w_l_pad, w_r_pad, b_pad, ci_p, co_p))

    def __call__(self, x, edge_index, tm=512, tk=1024):
        n = x.shape[0]
        # Clamp tiles for small graphs; pad N so both (possibly rectangular)
        # tile sizes divide it.
        n_min = _round_up(n, 256)
        tm = max(256, min(tm, n_min))
        tk = max(256, min(tk, n_min))
        n_p = _round_up(n, tm * tk // math.gcd(tm, tk))

        counts, deg_inv = build_adjacency(edge_index, n)
        a_p = jnp.zeros((n_p, n_p), jnp.int8).at[:n, :n].set(counts)
        dinv_p = jnp.ones((n_p, 1), jnp.float32).at[:n, :].set(deg_inv)

        max_cin = max(layer[3] for layer in self.layers)
        # resident x budget (bf16, double-buffered by the default pipeline)
        assert n_p * max_cin * 2 * 2 <= 16 * 1024 * 1024, (
            "x too large to keep VMEM-resident")
        # TODO(synk): for larger graphs fall back to block-tiled x specs or a
        # CSR + scalar-prefetch gather kernel instead of the resident-x path.

        h = jnp.zeros((n_p, self.layers[0][3]), jnp.bfloat16)
        h = h.at[:n, :x.shape[1]].set(x.astype(jnp.bfloat16))
        # x = dropout(x) -> identity (inference)
        for i in range(self.num_layers):
            w_l, w_r, b_pad, _, _ = self.layers[i]
            last = i == self.num_layers - 1
            h = sage_layer(a_p, h, dinv_p, w_l, w_r, b_pad,
                           apply_relu=not last,
                           out_dtype=jnp.float32 if last else jnp.bfloat16,
                           tm=tm, tk=tk)
            # x = dropout(x) -> identity (inference)
        if self.return_emb:
            return h[:n, :self.hidden_channels]
        return h[:n, :self.s_channels]


# ---------------------------------------------------------------------------
# Pure-JAX reference (unfolded params, f32) for correctness checking
# ---------------------------------------------------------------------------
def reference_forward(model, x, edge_index):
    n = x.shape[0]
    counts, deg_inv = build_adjacency(edge_index, n)
    a = counts.astype(jnp.float32) * deg_inv
    h = x
    for i in range(model.num_layers):
        wl, wr, b = model.raw_convs[i]
        h = (a @ h) @ wl + h @ wr + b[None, :]
        last = i == model.num_layers - 1
        if last:
            if model.return_emb:
                return h
            break
        mean, var, gamma, beta = model.raw_norms[i]
        h = (h - mean) / jnp.sqrt(var + model.eps) * gamma + beta
        h = jnp.maximum(h, 0.0)
    return h @ model.raw_linear_w


# ---------------------------------------------------------------------------
# Main
# ---------------------------------------------------------------------------
if __name__ == "__main__":
    key = jax.random.PRNGKey(0)
    k_x, k_e, k_params = jax.random.split(key, 3)

    # Small synthetic graph (padded internally to 512 nodes / 128 lanes).
    num_nodes = 500
    in_channels = 16
    hidden_channels = 32
    s_channels = 8
    num_layers = 3
    num_edges = 2000

    x = jax.random.normal(k_x, (num_nodes, in_channels), jnp.float32)
    edge_index = jax.random.randint(k_e, (2, num_edges), 0, num_nodes,
                                    dtype=jnp.int32)

    model = GraphSAGEPallas(in_channels, hidden_channels, s_channels,
                            num_layers, dropout=0.5, return_emb=False,
                            key=k_params)

    out = jax.block_until_ready(model(x, edge_index))
    assert out.shape == (num_nodes, s_channels), out.shape
    assert bool(jnp.all(jnp.isfinite(out)))

    ref = reference_forward(model, x, edge_index)
    err = float(jnp.max(jnp.abs(out - ref) / (1.0 + jnp.abs(ref))))
    assert err < 5e-2, f"max relative error {err}"

    print("KERNEL_OK")
</pallas_src>

<mosaic_0001>
module attributes {stable_mosaic.version = 11 : i64} {
  func.func @_sage_layer_kernel(%arg0: i32, %arg1: i32, %arg2: memref<512x512xi8, #tpu.memory_space<vmem>>, %arg3: memref<512x128xbf16, #tpu.memory_space<vmem>>, %arg4: memref<512x1xf32, #tpu.memory_space<vmem>>, %arg5: memref<128x128xbf16, #tpu.memory_space<vmem>>, %arg6: memref<128x128xbf16, #tpu.memory_space<vmem>>, %arg7: memref<1x128xf32, #tpu.memory_space<vmem>>, %arg8: memref<512x128xbf16, #tpu.memory_space<vmem>>, %arg9: memref<512x128xf32, #tpu.memory_space<vmem>>) attributes {dimension_semantics = [#tpu.dimension_semantics<parallel>, #tpu.dimension_semantics<arbitrary>], iteration_bounds = array<i64: 1, 1>, scalar_prefetch = 0 : i64, scratch_operands = 1 : i64, tpu.core_type = #tpu.core_type<tc>, window_params = [{transform_indices = @transform_0, window_bounds = array<i64: 512, 512>}, {pipeline_mode = #tpu.pipeline_mode<synchronous>, transform_indices = @transform_1, window_bounds = array<i64: 512, 128>}, {transform_indices = @transform_2, window_bounds = array<i64: 512, 1>}, {pipeline_mode = #tpu.pipeline_mode<synchronous>, transform_indices = @transform_3, window_bounds = array<i64: 128, 128>}, {pipeline_mode = #tpu.pipeline_mode<synchronous>, transform_indices = @transform_4, window_bounds = array<i64: 128, 128>}, {pipeline_mode = #tpu.pipeline_mode<synchronous>, transform_indices = @transform_5, window_bounds = array<i64: 1, 128>}, {transform_indices = @transform_6, window_bounds = array<i64: 512, 128>}]} {
    %c0_i32 = arith.constant 0 : i32
    %0 = arith.cmpi eq, %arg1, %c0_i32 : i32
    %1 = arith.extui %0 : i1 to i32
    %c0_i32_0 = arith.constant 0 : i32
    %2 = arith.cmpi ne, %1, %c0_i32_0 : i32
    scf.if %2 {
      %cst_9 = arith.constant 0.000000e+00 : f32
      %16 = vector.broadcast %cst_9 : f32 to vector<512x128xf32>
      %c0_10 = arith.constant 0 : index
      %c0_11 = arith.constant 0 : index
      %17 = vector.load %arg9[%c0_10, %c0_11] : memref<512x128xf32, #tpu.memory_space<vmem>>, vector<512x128xf32>
      tpu.vector_store %arg9[%c0_10, %c0_11], %16 {strides = array<i32>} : memref<512x128xf32, #tpu.memory_space<vmem>>, vector<512x128xf32>,
    } else {
    }
    %c512_i32 = arith.constant 512 : i32
    %3 = arith.muli %arg1, %c512_i32 : i32
    %4 = tpu.assume_multiple %3, 512 : i32
    %5 = arith.index_cast %4 : i32 to index
    %c0 = arith.constant 0 : index
    %6 = vector.load %arg3[%5, %c0] : memref<512x128xbf16, #tpu.memory_space<vmem>>, vector<512x128xbf16>
    %c0_1 = arith.constant 0 : index
    %c0_2 = arith.constant 0 : index
    %7 = vector.load %arg2[%c0_1, %c0_2] : memref<512x512xi8, #tpu.memory_space<vmem>>, vector<512x512xi8>
    %8 = arith.sitofp %7 : vector<512x512xi8> to vector<512x512xbf16>
    %c0_3 = arith.constant 0 : index
    %c0_4 = arith.constant 0 : index
    %9 = vector.load %arg9[%c0_3, %c0_4] : memref<512x128xf32, #tpu.memory_space<vmem>>, vector<512x128xf32>
    %cst = arith.constant dense<0.000000e+00> : vector<512x128xf32>
    %10 = tpu.matmul %8, %6, %cst {dimension_numbers = #tpu.dot_dimension_numbers<[1], [0], [0], [1], [0, 0, 1, 1], [], []>} : vector<512x512xbf16>, vector<512x128xbf16>, vector<512x128xf32> -> vector<512x128xf32>
    %11 = arith.addf %9, %10 : vector<512x128xf32>
    %c0_5 = arith.constant 0 : index
    %c0_6 = arith.constant 0 : index
    %12 = vector.load %arg9[%c0_5, %c0_6] : memref<512x128xf32, #tpu.memory_space<vmem>>, vector<512x128xf32>
    tpu.vector_store %arg9[%c0_5, %c0_6], %11 {strides = array<i32>} : memref<512x128xf32, #tpu.memory_space<vmem>>, vector<512x128xf32>,
    %c0_i32_7 = arith.constant 0 : i32
    %13 = arith.cmpi eq, %arg1, %c0_i32_7 : i32
    %14 = arith.extui %13 : i1 to i32
    %c0_i32_8 = arith.constant 0 : i32
    %15 = arith.cmpi ne, %14, %c0_i32_8 : i32
    scf.if %15 {
      %c0_9 = arith.constant 0 : index
      %c0_10 = arith.constant 0 : index
      %16 = vector.load %arg9[%c0_9, %c0_10] : memref<512x128xf32, #tpu.memory_space<vmem>>, vector<512x128xf32>
      %c0_11 = arith.constant 0 : index
      %c0_12 = arith.constant 0 : index
      %17 = vector.load %arg4[%c0_11, %c0_12] : memref<512x1xf32, #tpu.memory_space<vmem>>, vector<512x1xf32>
      %18 = vector.broadcast %17 : vector<512x1xf32> to vector<512x128xf32>
      %19 = arith.mulf %16, %18 : vector<512x128xf32>
      %20 = arith.truncf %19 : vector<512x128xf32> to vector<512x128xbf16>
      %c512_i32_13 = arith.constant 512 : i32
      %21 = arith.muli %arg0, %c512_i32_13 : i32
      %22 = tpu.assume_multiple %21, 512 : i32
      %23 = arith.index_cast %22 : i32 to index
      %c0_14 = arith.constant 0 : index
      %24 = vector.load %arg3[%23, %c0_14] : memref<512x128xbf16, #tpu.memory_space<vmem>>, vector<512x128xbf16>
      %c0_15 = arith.constant 0 : index
      %c0_16 = arith.constant 0 : index
      %25 = vector.load %arg5[%c0_15, %c0_16] : memref<128x128xbf16, #tpu.memory_space<vmem>>, vector<128x128xbf16>
      %cst_17 = arith.constant dense<0.000000e+00> : vector<512x128xf32>
      %26 = tpu.matmul %20, %25, %cst_17 {dimension_numbers = #tpu.dot_dimension_numbers<[1], [0], [0], [1], [0, 0, 1, 1], [], []>} : vector<512x128xbf16>, vector<128x128xbf16>, vector<512x128xf32> -> vector<512x128xf32>
      %c0_18 = arith.constant 0 : index
      %c0_19 = arith.constant 0 : index
      %27 = vector.load %arg6[%c0_18, %c0_19] : memref<128x128xbf16, #tpu.memory_space<vmem>>, vector<128x128xbf16>
      %cst_20 = arith.constant dense<0.000000e+00> : vector<512x128xf32>
      %28 = tpu.matmul %24, %27, %cst_20 {dimension_numbers = #tpu.dot_dimension_numbers<[1], [0], [0], [1], [0, 0, 1, 1], [], []>} : vector<512x128xbf16>, vector<128x128xbf16>, vector<512x128xf32> -> vector<512x128xf32>
      %29 = arith.addf %26, %28 : vector<512x128xf32>
      %c0_21 = arith.constant 0 : index
      %c0_22 = arith.constant 0 : index
      %30 = vector.load %arg7[%c0_21, %c0_22] : memref<1x128xf32, #tpu.memory_space<vmem>>, vector<1x128xf32>
      %31 = vector.broadcast %30 : vector<1x128xf32> to vector<512x128xf32>
      %32 = arith.addf %29, %31 : vector<512x128xf32>
      %cst_23 = arith.constant 0.000000e+00 : f32
      %33 = vector.broadcast %cst_23 : f32 to vector<512x128xf32>
      %34 = arith.maximumf %32, %33 : vector<512x128xf32>
      %35 = arith.truncf %34 : vector<512x128xf32> to vector<512x128xbf16>
      %c0_24 = arith.constant 0 : index
      %c0_25 = arith.constant 0 : index
      %36 = vector.load %arg8[%c0_24, %c0_25] : memref<512x128xbf16, #tpu.memory_space<vmem>>, vector<512x128xbf16>
      tpu.vector_store %arg8[%c0_24, %c0_25], %35 {strides = array<i32>} : memref<512x128xbf16, #tpu.memory_space<vmem>>, vector<512x128xbf16>,
    } else {
    }
    return
  }
  func.func @transform_0(%arg0: i32, %arg1: i32) -> (i32, i32) {
    %c0_i32 = arith.constant 0 : i32
    return %arg0, %arg1 : i32, i32
  }
  func.func @transform_1(%arg0: i32, %arg1: i32) -> (i32, i32) {
    %c0_i32 = arith.constant 0 : i32
    %c0_i32_0 = arith.constant 0 : i32
    %c0_i32_1 = arith.constant 0 : i32
    return %c0_i32, %c0_i32_0 : i32, i32
  }
  func.func @transform_2(%arg0: i32, %arg1: i32) -> (i32, i32) {
    %c0_i32 = arith.constant 0 : i32
    %c0_i32_0 = arith.constant 0 : i32
    return %arg0, %c0_i32 : i32, i32
  }
  func.func @transform_3(%arg0: i32, %arg1: i32) -> (i32, i32) {
    %c0_i32 = arith.constant 0 : i32
    %c0_i32_0 = arith.constant 0 : i32
    %c0_i32_1 = arith.constant 0 : i32
    return %c0_i32, %c0_i32_0 : i32, i32
  }
  func.func @transform_4(%arg0: i32, %arg1: i32) -> (i32, i32) {
    %c0_i32 = arith.constant 0 : i32
    %c0_i32_0 = arith.constant 0 : i32
    %c0_i32_1 = arith.constant 0 : i32
    return %c0_i32, %c0_i32_0 : i32, i32
  }
  func.func @transform_5(%arg0: i32, %arg1: i32) -> (i32, i32) {
    %c0_i32 = arith.constant 0 : i32
    %c0_i32_0 = arith.constant 0 : i32
    %c0_i32_1 = arith.constant 0 : i32
    return %c0_i32, %c0_i32_0 : i32, i32
  }
  func.func @transform_6(%arg0: i32, %arg1: i32) -> (i32, i32) {
    %c0_i32 = arith.constant 0 : i32
    %c0_i32_0 = arith.constant 0 : i32
    return %arg0, %c0_i32 : i32, i32
  }
}

</mosaic_0001>

<bundles_post_ra>
// kernel: tpu_custom_call.1
= control target key start
LH: loop header
LB: loop body
LE: loop exit
PB: predicated region body
PF: predicated region fallthrough
CT: control target
= control target key end

     0   :  { %11 = vsyncpa [#allocation4], 0  ;;  %s5075_s0 = inlined_call_operand.vmem [shape: s8[512,512], index: 0, kind: input, shape index: {}]   ;;  %s5076_s1 = inlined_call_operand.hbm [shape: bf16[512,128], index: 1, kind: input, shape index: {}]   ;;  %s5077_s2 = inlined_call_operand.vmem [shape: f32[512,1], index: 2, kind: input, shape index: {}]   ;;  %s5078_s3 = inlined_call_operand.hbm [shape: bf16[128,128], index: 3, kind: input, shape index: {}]   ;;  %s5079_s4 = inlined_call_operand.hbm [shape: bf16[128,128], index: 4, kind: input, shape index: {}]   ;;  %s5080_s5 = inlined_call_operand.vmem [shape: f32[1,128], index: 5, kind: input, shape index: {}]   ;;  %s5081_s6 = inlined_call_operand.hbm [shape: bf16[512,128], index: 6, kind: output, shape index: {}]  }
   0x1   :  { %12 = vsyncpa [#allocation7], 0 }
   0x2   :  { %13 = vsyncpa [#allocation5], 0  ;;  %s4363_s21 = smov [#allocation6]   ;;  %s4364_s23 = smov [#allocation3]  }
   0x3   :  { %s35_s22 = sshll.u32 %s4363_s21, 4  ;;  %s21_s24 = sshll.u32 %s4364_s23, 4  ;;  %s36_s22 = int_to_ptr.vmem [resolvable:$true] %s35_s22  ;;  %s4405_s24 = int_to_ptr.vmem [resolvable:$true] %s21_s24 }
   0x4   :  { %s4269_s27 = scalar_lea.hbm %s5078_s3, 1024 }
   0x5   :  { %p4270_p0 = scmp.ne.s32.totalorder %s5078_s3, %s4269_s27  ;;  %p4273_p1 = scmp.lt.u32.totalorder %s4269_s27, %s5078_s3 }
   0x7   :  { %p4275_p2 = pnand %p4273_p1, %p4270_p0 }
   0x9   :  { %4278 = shalt.err (!%p4275_p2)
}
   0xa   :  { %s4279_s8 = scalar_lea.vmem %s36_s22, 1024  ;;  %p4284_p4 = scmp.lt.s32.totalorder %s36_s22, %s36_s22 }
   0xb   :  { %p4280_p3 = scmp.ne.s32.totalorder %s36_s22, %s4279_s8  ;;  %p4285_p5 = scmp.lt.s32.totalorder %s4279_s8, %s4279_s8 }
   0xd   :  { %p4286_p6 = por %p4285_p5, %p4284_p4 }
   0xf   :  { %p4287_p7 = pnand %p4286_p6, %p4280_p3 }
  0x11   :  { %4290 = shalt.err (!%p4287_p7)
}
  0x12   :  { %s4365_s9 = smov 64   ;;  %s4366_s10 = smov 4  }
  0x13   :  { %41 = dma.hbm_to_vmem [thread:$0]  %s5078_s3, 1024, %s36_s22, [#allocation7], %s4365_s9, %s4365_s9, %s4366_s10  }
  0x14   :  { %s4291_s15 = scalar_lea.hbm %s5076_s1, 4096 }
  0x15   :  { %p4292_p8 = scmp.ne.s32.totalorder %s5076_s1, %s4291_s15  ;;  %p4295_p9 = scmp.lt.u32.totalorder %s4291_s15, %s5076_s1 }
  0x17   :  { %p4297_p10 = pnand %p4295_p9, %p4292_p8 }
  0x19   :  { %4300 = shalt.err (!%p4297_p10)
}
  0x1a   :  { %s4301_s20 = scalar_lea.vmem %s4405_s24, 4096  ;;  %p4306_p12 = scmp.lt.s32.totalorder %s4405_s24, %s4405_s24 }
  0x1b   :  { %p4302_p11 = scmp.ne.s32.totalorder %s4405_s24, %s4301_s20  ;;  %p4307_p13 = scmp.lt.s32.totalorder %s4301_s20, %s4301_s20 }
  0x1d   :  { %p4308_p0 = por %p4307_p13, %p4306_p12 }
  0x1f   :  { %p4309_p1 = pnand %p4308_p0, %p4302_p11 }
  0x21   :  { %4312 = shalt.err (!%p4309_p1)
}
  0x22   :  { %27 = dma.hbm_to_vmem [thread:$0]  %s5076_s1, 4096, %s4405_s24, [#allocation4], %s4365_s9, %s4365_s9, %s4366_s10  }
  0x23   :  { %s4367_s22 = smov [#allocation8]   ;;  %s4313_s27 = scalar_lea.hbm %s5079_s4, 1024 }
  0x24   :  { %s47_s23 = sshll.u32 %s4367_s22, 4  ;;  %p4314_p2 = scmp.ne.s32.totalorder %s5079_s4, %s4313_s27  ;;  %s48_s23 = int_to_ptr.vmem [resolvable:$true] %s47_s23 }
  0x25   :  { %p4317_p3 = scmp.lt.u32.totalorder %s4313_s27, %s5079_s4 }
  0x27   :  { %p4319_p4 = pnand %p4317_p3, %p4314_p2 }
  0x29   :  { %4322 = shalt.err (!%p4319_p4)
}
  0x2a   :  { %s4323_s8 = scalar_lea.vmem %s48_s23, 1024  ;;  %p4328_p6 = scmp.lt.s32.totalorder %s48_s23, %s48_s23 }
  0x2b   :  { %p4324_p5 = scmp.ne.s32.totalorder %s48_s23, %s4323_s8  ;;  %p4329_p7 = scmp.lt.s32.totalorder %s4323_s8, %s4323_s8 }
  0x2d   :  { %p4330_p8 = por %p4329_p7, %p4328_p6 }
  0x2f   :  { %p4331_p9 = pnand %p4330_p8, %p4324_p5 }
  0x31   :  { %4334 = shalt.err (!%p4331_p9)
}
  0x32   :  { %53 = dma.hbm_to_vmem [thread:$0]  %s5079_s4, 1024, %s48_s23, [#allocation7], %s4365_s9, %s4365_s9, %s4366_s10  }
  0x33   :  { %4357 = dma.done.wait [#allocation4], 4096  }
  0x34   :  { %4358 = vsyncadd [#allocation4], 4294963200 }
  0x35   :  { %4359 = dma.done.wait [#allocation7], 2048  }
  0x36   :  { %4360 = vsyncadd [#allocation7], 4294965248  ;;  %v4368_v0 = vmov 0   ;;  %v4189_v1 = vld [vmem:[#allocation3] sm:$0xff]   ;;  %v4190_v2 = vld [vmem:[#allocation3 + $0x8] sm:$0xff]  }
  0x37   :  { %651 = vmatprep.subr.bf16.mxu0 %v4368_v0  ;;  %3988 = vmatprep.subr.bf16.mxu1 %v4368_v0  ;;  %v4191_v3 = vld [vmem:[#allocation3 + $0x10] sm:$0xff]   ;;  %v4192_v4 = vld [vmem:[#allocation3 + $0x18] sm:$0xff]   ;;  %v4193_v5 = vld [vmem:[#allocation3 + $0x20] sm:$0xff]  }
  0x38   :  { %4187 = vset.pattern.permute.xlu0 %v4368_v0  ;;  %4188 = vset.pattern.permute.xlu1 %v4368_v0  ;;  %v4472_v6 = vld [vmem:[%s5075_s0 + $0x8] sm:$0xff]  ;;  %v4195_v9 = vld [vmem:[#allocation3 + $0x30] sm:$0xff]   ;;  %v4196_v10 = vld [vmem:[#allocation3 + $0x38] sm:$0xff]  }
  0x39   :  { %652 = vmatpush1.bf16.msra.mxu0 %v4189_v1  ;;  %4004 = vmatpush1.bf16.msra.mxu1 %v4189_v1  ;;  %v268_v7 = vunpack.c.l.s8.bf16 %v4472_v6  ;;  %v4194_v8 = vld [vmem:[#allocation3 + $0x28] sm:$0xff]   ;;  %v4197_v11 = vld [vmem:[#allocation3 + $0x40] sm:$0xff]   ;;  %v4199_v15 = vld [vmem:[#allocation3 + $0x50] sm:$0xff]   ;;  %v272_v26 = vunpack.c.h.s8.bf16 %v4472_v6 }
  0x3a   :  { %653 = vmatprep.subr.bf16.mxu0 %v4368_v0  ;;  %3989 = vmatprep.subr.bf16.mxu1 %v4368_v0  ;;  %v236_v12 = vld [vmem:[%s5075_s0 + $0x108] sm:$0xff]  ;;  %v4200_v16 = vld [vmem:[#allocation3 + $0x58] sm:$0xff]   ;;  %v4201_v17 = vld [vmem:[#allocation3 + $0x60] sm:$0xff]  }
  0x3b   :  { %683 = vmatprep.mubr.bf16.mxu0 %v268_v7  ;;  %v332_v13 = vunpack.c.l.s8.bf16 %v236_v12  ;;  %v4198_v14 = vld [vmem:[#allocation3 + $0x48] sm:$0xff]   ;;  %v4203_v19 = vld [vmem:[#allocation3 + $0x70] sm:$0xff]   ;;  %v4204_v20 = vld [vmem:[#allocation3 + $0x78] sm:$0xff]   ;;  %v336_v27 = vunpack.c.h.s8.bf16 %v236_v12 }
  0x3c   :  { %v4202_v18 = vld [vmem:[#allocation3 + $0x68] sm:$0xff]   ;;  %v203_v21 = vld [vmem:[%s5075_s0] sm:$0xff]  ;;  %v4207_v31 = vld [vmem:[#allocation3 + $0x90] sm:$0xff]  }
  0x3d   :  { %654 = vmatpush1.bf16.msra.mxu0 %v4190_v2  ;;  %4005 = vmatpush1.bf16.msra.mxu1 %v4190_v2  ;;  %v235_v22 = vld [vmem:[%s5075_s0 + $0x100] sm:$0xff]  ;;  %v267_v24 = vunpack.c.l.s8.bf16 %v203_v21  ;;  %v4206_v28 = vld [vmem:[#allocation3 + $0x88] sm:$0xff]   ;;  %v271_v32 = vunpack.c.h.s8.bf16 %v203_v21  ;;  %v4208_v37 = vld [vmem:[#allocation3 + $0x98] sm:$0xff]  }
  0x3e   :  { %655 = vmatprep.subr.bf16.mxu0 %v4368_v0  ;;  %3990 = vmatprep.subr.bf16.mxu1 %v4368_v0  ;;  %v4205_v23 = vld [vmem:[#allocation3 + $0x80] sm:$0xff]   ;;  %v331_v25 = vunpack.c.l.s8.bf16 %v235_v22  ;;  %v208_v29 = vld [vmem:[%s5075_s0 + $0x28] sm:$0xff]  ;;  %v335_v33 = vunpack.c.h.s8.bf16 %v235_v22  ;;  %v4211_v50 = vld [vmem:[#allocation3 + $0xb0] sm:$0xff]  }
  0x3f   :  { %811 = vmatprep.mubr.bf16.mxu1 %v332_v13  ;;  %v240_v30 = vld [vmem:[%s5075_s0 + $0x128] sm:$0xff]  ;;  %v276_v34 = vunpack.c.l.s8.bf16 %v208_v29  ;;  %v207_v36 = vld [vmem:[%s5075_s0 + $0x20] sm:$0xff]  ;;  %v280_v41 = vunpack.c.h.s8.bf16 %v208_v29  ;;  %v4212_v53 = vld [vmem:[#allocation3 + $0xb8] sm:$0xff]  }
  0x40   :  { %v340_v35 = vunpack.c.l.s8.bf16 %v240_v30  ;;  %v239_v38 = vld [vmem:[%s5075_s0 + $0x120] sm:$0xff]  ;;  %v275_v39 = vunpack.c.l.s8.bf16 %v207_v36  ;;  %v344_v43 = vunpack.c.h.s8.bf16 %v240_v30  ;;  %v4210_v44 = vld [vmem:[#allocation3 + $0xa8] sm:$0xff]   ;;  %v279_v47 = vunpack.c.h.s8.bf16 %v207_v36  ;;  %v4216_v6 = vld [vmem:[#allocation3 + $0xd8] sm:$0xff]  }
  0x41   :  { %656 = vmatpush1.bf16.msra.mxu0 %v4191_v3  ;;  %4006 = vmatpush1.bf16.msra.mxu1 %v4191_v3  ;;  %v339_v40 = vunpack.c.l.s8.bf16 %v239_v38  ;;  %v4209_v42 = vld [vmem:[#allocation3 + $0xa0] sm:$0xff]   ;;  %v212_v45 = vld [vmem:[%s5075_s0 + $0x48] sm:$0xff]  ;;  %v343_v48 = vunpack.c.h.s8.bf16 %v239_v38  ;;  %v4215_v3 = vld [vmem:[#allocation3 + $0xd0] sm:$0xff]  }
  0x42   :  { %657 = vmatprep.subr.bf16.mxu0 %v4368_v0  ;;  %3991 = vmatprep.subr.bf16.mxu1 %v4368_v0  ;;  %v244_v46 = vld [vmem:[%s5075_s0 + $0x148] sm:$0xff]  ;;  %v284_v49 = vunpack.c.l.s8.bf16 %v212_v45  ;;  %v211_v52 = vld [vmem:[%s5075_s0 + $0x40] sm:$0xff]  ;;  %v288_v57 = vunpack.c.h.s8.bf16 %v212_v45  ;;  %v4220_v22 = vld [vmem:[#allocation3 + $0xf8] sm:$0xff]  }
  0x43   :  { %v348_v51 = vunpack.c.l.s8.bf16 %v244_v46  ;;  %v243_v54 = vld [vmem:[%s5075_s0 + $0x140] sm:$0xff]  ;;  %v283_v55 = vunpack.c.l.s8.bf16 %v211_v52  ;;  %v352_v59 = vunpack.c.h.s8.bf16 %v244_v46  ;;  %v4214_v60 = vld [vmem:[#allocation3 + $0xc8] sm:$0xff]   ;;  %v287_v63 = vunpack.c.h.s8.bf16 %v211_v52  ;;  %v4224_v36 = vld [vmem:[#allocation8 + $0x18] sm:$0xff]  }
  0x44   :  { %v347_v56 = vunpack.c.l.s8.bf16 %v243_v54  ;;  %v4213_v58 = vld [vmem:[#allocation3 + $0xc0] sm:$0xff]   ;;  %v216_v61 = vld [vmem:[%s5075_s0 + $0x68] sm:$0xff]  ;;  %v351_v1 = vunpack.c.h.s8.bf16 %v243_v54  ;;  %v4227_v54 = vld [vmem:[#allocation8 + $0x30] sm:$0xff]  }
  0x45   :  { %658 = vmatpush1.bf16.msra.mxu0 %v4192_v4  ;;  %4007 = vmatpush1.bf16.msra.mxu1 %v4192_v4  ;;  %v248_v62 = vld [vmem:[%s5075_s0 + $0x168] sm:$0xff]  ;;  %v292_v2 = vunpack.c.l.s8.bf16 %v216_v61  ;;  %v247_v7 = vld [vmem:[%s5075_s0 + $0x160] sm:$0xff] }
  0x46   :  { %659 = vmatprep.subr.bf16.mxu0 %v4368_v0  ;;  %3992 = vmatprep.subr.bf16.mxu1 %v4368_v0  ;;  %v356_v4 = vunpack.c.l.s8.bf16 %v248_v62  ;;  %v360_v12 = vunpack.c.h.s8.bf16 %v248_v62  ;;  %v4218_v13 = vld [vmem:[#allocation3 + $0xe8] sm:$0xff]   ;;  %v219_v21 = vld [vmem:[%s5075_s0 + $0x80] sm:$0xff] }
  0x47   :  { %v4222_v29 = vld [vmem:[#allocation8 + $0x8] sm:$0xff]   ;;  %v255_v38 = vld [vmem:[%s5075_s0 + $0x1a0] sm:$0xff] }
  0x48   :  { %v224_v30 = vld [vmem:[%s5075_s0 + $0xa8] sm:$0xff] }
  0x49   :  { %660 = vmatpush1.bf16.msra.mxu0 %v4193_v5  ;;  %4008 = vmatpush1.bf16.msra.mxu1 %v4193_v5  ;;  %v215_v5 = vld [vmem:[%s5075_s0 + $0x60] sm:$0xff]  ;;  %v4226_v45 = vld [vmem:[#allocation8 + $0x28] sm:$0xff]  }
  0x4a   :  { %661 = vmatprep.subr.bf16.mxu0 %v4368_v0  ;;  %3993 = vmatprep.subr.bf16.mxu1 %v4368_v0  ;;  %v228_v46 = vld [vmem:[%s5075_s0 + $0xc8] sm:$0xff] }
  0x4b   :  { %v320_v62 = vunpack.c.h.s8.bf16 %v228_v46 }
  0x4d   :  { %662 = vmatpush1.bf16.msra.mxu0 %v4194_v8  ;;  %4009 = vmatpush1.bf16.msra.mxu1 %v4194_v8  ;;  %v291_v8 = vunpack.c.l.s8.bf16 %v215_v5 }
  0x4e   :  { %663 = vmatprep.subr.bf16.mxu0 %v4368_v0  ;;  %3994 = vmatprep.subr.bf16.mxu1 %v4368_v0 }
  0x51   :  { %664 = vmatpush1.bf16.msra.mxu0 %v4195_v9  ;;  %4010 = vmatpush1.bf16.msra.mxu1 %v4195_v9  ;;  %v355_v9 = vunpack.c.l.s8.bf16 %v247_v7 }
  0x52   :  { %665 = vmatprep.subr.bf16.mxu0 %v4368_v0  ;;  %3995 = vmatprep.subr.bf16.mxu1 %v4368_v0 }
  0x55   :  { %666 = vmatpush1.bf16.msra.mxu0 %v4196_v10  ;;  %4011 = vmatpush1.bf16.msra.mxu1 %v4196_v10  ;;  %v296_v10 = vunpack.c.h.s8.bf16 %v216_v61 }
  0x56   :  { %667 = vmatprep.subr.bf16.mxu0 %v4368_v0  ;;  %3996 = vmatprep.subr.bf16.mxu1 %v4368_v0 }
  0x59   :  { %668 = vmatpush1.bf16.msra.mxu0 %v4197_v11  ;;  %4012 = vmatpush1.bf16.msra.mxu1 %v4197_v11  ;;  %v4217_v11 = vld [vmem:[#allocation3 + $0xe0] sm:$0xff]  }
  0x5a   :  { %669 = vmatprep.subr.bf16.mxu0 %v4368_v0  ;;  %3997 = vmatprep.subr.bf16.mxu1 %v4368_v0 }
  0x5d   :  { %670 = vmatpush1.bf16.msra.mxu0 %v4198_v14  ;;  %4013 = vmatpush1.bf16.msra.mxu1 %v4198_v14  ;;  %v220_v14 = vld [vmem:[%s5075_s0 + $0x88] sm:$0xff] }
  0x5e   :  { %671 = vmatprep.subr.bf16.mxu0 %v4368_v0  ;;  %3998 = vmatprep.subr.bf16.mxu1 %v4368_v0 }
  0x61   :  { %672 = vmatpush1.bf16.msra.mxu0 %v4199_v15  ;;  %4014 = vmatpush1.bf16.msra.mxu1 %v4199_v15  ;;  %v252_v15 = vld [vmem:[%s5075_s0 + $0x188] sm:$0xff] }
  0x62   :  { %673 = vmatprep.subr.bf16.mxu0 %v4368_v0  ;;  %3999 = vmatprep.subr.bf16.mxu1 %v4368_v0 }
  0x65   :  { %674 = vmatpush1.bf16.msra.mxu0 %v4200_v16  ;;  %4015 = vmatpush1.bf16.msra.mxu1 %v4200_v16  ;;  %v295_v16 = vunpack.c.h.s8.bf16 %v215_v5  ;;  %v1431_v5 = vld [vmem:[%s5077_s2 + $0x38] sm:$0xff] }
  0x66   :  { %675 = vmatprep.subr.bf16.mxu0 %v4368_v0  ;;  %4000 = vmatprep.subr.bf16.mxu1 %v4368_v0 }
  0x69   :  { %676 = vmatpush1.bf16.msra.mxu0 %v4201_v17  ;;  %4016 = vmatpush1.bf16.msra.mxu1 %v4201_v17  ;;  %v359_v17 = vunpack.c.h.s8.bf16 %v247_v7 }
  0x6a   :  { %677 = vmatprep.subr.bf16.mxu0 %v4368_v0  ;;  %4001 = vmatprep.subr.bf16.mxu1 %v4368_v0 }
  0x6d   :  { %678 = vmatpush1.bf16.msra.mxu0 %v4202_v18  ;;  %4017 = vmatpush1.bf16.msra.mxu1 %v4202_v18  ;;  %v300_v18 = vunpack.c.l.s8.bf16 %v220_v14 }
  0x6e   :  { %679 = vmatprep.subr.bf16.mxu0 %v4368_v0  ;;  %4002 = vmatprep.subr.bf16.mxu1 %v4368_v0 }
  0x71   :  { %680 = vmatpush1.bf16.msra.mxu0 %v4203_v19  ;;  %4018 = vmatpush1.bf16.msra.mxu1 %v4203_v19  ;;  %v4219_v19 = vld [vmem:[#allocation3 + $0xf0] sm:$0xff]  }
  0x72   :  { %681 = vmatprep.subr.bf16.mxu0 %v4368_v0  ;;  %4003 = vmatprep.subr.bf16.mxu1 %v4368_v0 }
  0x75   :  { %682 = vmatpush1.bf16.msra.mxu0 %v4204_v20  ;;  %4019 = vmatpush1.bf16.msra.mxu1 %v4204_v20  ;;  %v364_v20 = vunpack.c.l.s8.bf16 %v252_v15 }
  0x76   :  { %940 = vmatprep.subr.bf16.mxu0 %v4368_v0 }
  0x78   :  { %684 = vmatmul.mubr.bf16.vlgmr.msra.gmra.mrb[0].mxu0 %v267_v24  ;;  %812 = vmatmul.mubr.bf16.vlgmr.msra.gmra.mrb[0].mxu1 %v331_v25  ;;  %v299_v24 = vunpack.c.l.s8.bf16 %v219_v21 }
  0x79   :  { %941 = vmatpush1.bf16.msra.mxu0 %v4205_v23  ;;  %691 = vmatprep.mubr.bf16.mxu0 %v272_v26  ;;  %v251_v23 = vld [vmem:[%s5075_s0 + $0x180] sm:$0xff]  ;;  %v304_v26 = vunpack.c.h.s8.bf16 %v220_v14 }
  0x7a   :  { %942 = vmatprep.subr.bf16.mxu0 %v4368_v0  ;;  %819 = vmatprep.mubr.bf16.mxu1 %v336_v27  ;;  %v363_v25 = vunpack.c.l.s8.bf16 %v251_v23  ;;  %v368_v27 = vunpack.c.h.s8.bf16 %v252_v15  ;;  %v263_v14 = vld [vmem:[%s5075_s0 + $0x1e0] sm:$0xff]  ;;  %v1435_v15 = vld [vmem:[%s5077_s2 + $0x58] sm:$0xff] }
  0x7d   :  { %943 = vmatpush1.bf16.msra.mxu0 %v4206_v28  ;;  %v4221_v28 = vld [vmem:[#allocation8] sm:$0xff]  }
  0x7e   :  { %944 = vmatprep.subr.bf16.mxu0 %v4368_v0  ;;  %3828 = vmatprep.subr.bf16.mxu1 %v4221_v28 }
  0x7f   :  { %3829 = vmatpush3.bf16.msra.mxu1 %v4221_v28 }
  0x80   :  { %692 = vmatmul.mubr.bf16.gmra.mrb[4].mxu0 %v271_v32  ;;  %820 = vmatmul.mubr.bf16.gmra.mrb[4].mxu1 %v335_v33  ;;  %v367_v32 = vunpack.c.h.s8.bf16 %v251_v23  ;;  %v308_v33 = vunpack.c.l.s8.bf16 %v224_v30  ;;  %v206_v23 = vld [vmem:[%s5075_s0 + $0x18] sm:$0xff] }
  0x81   :  { %699 = vmatprep.mubr.bf16.mxu0 %v276_v34  ;;  %945 = vmatpush1.bf16.msra.mxu0 %v4207_v31  ;;  %v303_v31 = vunpack.c.h.s8.bf16 %v219_v21  ;;  %v1437_v21 = vld [vmem:[%s5077_s2 + $0x68] sm:$0xff]  ;;  %v270_v28 = vunpack.c.l.s8.bf16 %v206_v23 }
  0x82   :  { %946 = vmatprep.subr.bf16.mxu0 %v4368_v0  ;;  %827 = vmatprep.mubr.bf16.mxu1 %v340_v35  ;;  %v4223_v35 = vld [vmem:[#allocation8 + $0x10] sm:$0xff]  }
  0x83   :  { %3830 = vmatprep.subr.bf16.mxu1 %v4222_v29 }
  0x84   :  { %3831 = vmatpush3.bf16.msra.mxu1 %v4222_v29  ;;  %v4229_v29 = vld [vmem:[#allocation3] sm:$0xff]  }
  0x85   :  { %947 = vmatpush1.bf16.msra.mxu0 %v4208_v37  ;;  %v223_v37 = vld [vmem:[%s5075_s0 + $0xa0] sm:$0xff]  ;;  %3832 = vmatprep.subr.bf16.mxu1 %v4223_v35 }
  0x86   :  { %948 = vmatprep.subr.bf16.mxu0 %v4368_v0 }
  0x88   :  { %700 = vmatmul.mubr.bf16.gmra.mrb[8].mxu0 %v275_v39  ;;  %828 = vmatmul.mubr.bf16.gmra.mrb[8].mxu1 %v339_v40  ;;  %v307_v39 = vunpack.c.l.s8.bf16 %v223_v37  ;;  %v371_v40 = vunpack.c.l.s8.bf16 %v255_v38 }
  0x89   :  { %707 = vmatprep.mubr.bf16.mxu0 %v280_v41  ;;  %949 = vmatpush1.bf16.msra.mxu0 %v4209_v42  ;;  %v312_v41 = vunpack.c.h.s8.bf16 %v224_v30  ;;  %v1441_v30 = vld [vmem:[%s5077_s2 + $0x88] sm:$0xff] }
  0x8a   :  { %950 = vmatprep.subr.bf16.mxu0 %v4368_v0  ;;  %835 = vmatprep.mubr.bf16.mxu1 %v344_v43  ;;  %v4225_v43 = vld [vmem:[#allocation8 + $0x20] sm:$0xff]  }
  0x8b   :  { %3833 = vmatpush3.bf16.msra.mxu1 %v4223_v35  ;;  %v4230_v35 = vld [vmem:[#allocation3 + $0x8] sm:$0xff]  }
  0x8c   :  { %3834 = vmatprep.subr.bf16.mxu1 %v4224_v36 }
  0x8d   :  { %951 = vmatpush1.bf16.msra.mxu0 %v4210_v44  ;;  %v1424_v44 = vld [vmem:[%s5077_s2] sm:$0xff] }
  0x8e   :  { %952 = vmatprep.subr.bf16.mxu0 %v4368_v0  ;;  %1490 = vperm.xlu0 %4187, %v1424_v44   ;;  %v4232_v44 = vld [vmem:[#allocation3 + $0x18] sm:$0xff]  }
  0x8f   :  { %3835 = vmatpush3.bf16.msra.mxu1 %v4224_v36  ;;  %v274_v36 = vunpack.c.h.s8.bf16 %v206_v23  ;;  %v1467_v23 = vld [vmem:[%s5077_s2 + $0x158] sm:$0xff] }
  0x90   :  { %708 = vmatmul.mubr.bf16.gmra.mrb[12].mxu0 %v279_v47  ;;  %836 = vmatmul.mubr.bf16.gmra.mrb[12].mxu1 %v343_v48  ;;  %v260_v47 = vld [vmem:[%s5075_s0 + $0x1c8] sm:$0xff] }
  0x91   :  { %715 = vmatprep.mubr.bf16.mxu0 %v284_v49  ;;  %953 = vmatpush1.bf16.msra.mxu0 %v4211_v50  ;;  %v1425_v48 = vld [vmem:[%s5077_s2 + $0x8] sm:$0xff]  ;;  %v311_v49 = vunpack.c.h.s8.bf16 %v223_v37  ;;  %v375_v50 = vunpack.c.h.s8.bf16 %v255_v38  ;;  %v380_v52 = vunpack.c.l.s8.bf16 %v260_v47  ;;  %v4231_v37 = vld [vmem:[#allocation3 + $0x10] sm:$0xff]  }
  0x92   :  { %954 = vmatprep.subr.bf16.mxu0 %v4368_v0  ;;  %843 = vmatprep.mubr.bf16.mxu1 %v348_v51  ;;  %v316_v51 = vunpack.c.l.s8.bf16 %v228_v46  ;;  %v1445_v38 = vld [vmem:[%s5077_s2 + $0xa8] sm:$0xff]  ;;  %v4233_v46 = vld [vmem:[#allocation3 + $0x20] sm:$0xff]  }
  0x93   :  { %3836 = vmatprep.subr.bf16.mxu1 %v4225_v43  ;;  %1495 = vperm.xlu0 %4187, %v1425_v48   ;;  %v1450_v48 = vld [vmem:[%s5077_s2 + $0xd0] sm:$0xff] }
  0x94   :  { %3837 = vmatpush3.bf16.msra.mxu1 %v4225_v43 }
  0x95   :  { %955 = vmatpush1.bf16.msra.mxu0 %v4212_v53  ;;  %3838 = vmatprep.subr.bf16.mxu1 %v4226_v45  ;;  %v1426_v53 = vld [vmem:[%s5077_s2 + $0x10] sm:$0xff] }
  0x96   :  { %956 = vmatprep.subr.bf16.mxu0 %v4368_v0  ;;  %1500 = vperm.xlu1 %4188, %v1426_v53   ;;  %v4234_v53 = vld [vmem:[#allocation3 + $0x28] sm:$0xff]  }
  0x98   :  { %716 = vmatmul.mubr.bf16.gmra.mrb[16].mxu0 %v283_v55  ;;  %844 = vmatmul.mubr.bf16.gmra.mrb[16].mxu1 %v347_v56  ;;  %v4228_v55 = vld [vmem:[#allocation8 + $0x38] sm:$0xff]   ;;  %v227_v56 = vld [vmem:[%s5075_s0 + $0xc0] sm:$0xff] }
  0x99   :  { %723 = vmatprep.mubr.bf16.mxu0 %v288_v57  ;;  %957 = vmatpush1.bf16.msra.mxu0 %v4213_v58  ;;  %v259_v57 = vld [vmem:[%s5075_s0 + $0x1c0] sm:$0xff]  ;;  %v319_v7 = vunpack.c.h.s8.bf16 %v227_v56 }
  0x9a   :  { %958 = vmatprep.subr.bf16.mxu0 %v4368_v0  ;;  %851 = vmatprep.mubr.bf16.mxu1 %v352_v59  ;;  %v1428_v58 = vld [vmem:[%s5077_s2 + $0x20] sm:$0xff]  ;;  %v1427_v59 = vld [vmem:[%s5077_s2 + $0x18] sm:$0xff]  ;;  %v379_v61 = vunpack.c.l.s8.bf16 %v259_v57 }
  0x9b   :  { %3839 = vmatpush3.bf16.msra.mxu1 %v4226_v45  ;;  %1510 = vperm.xlu0 %4187, %v1428_v58   ;;  %v214_v58 = vld [vmem:[%s5075_s0 + $0x58] sm:$0xff] }
  0x9c   :  { %3840 = vmatprep.subr.bf16.mxu1 %v4227_v54  ;;  %1505 = vperm.xlu1 %4188, %v1427_v59   ;;  %v1455_v59 = vld [vmem:[%s5077_s2 + $0xf8] sm:$0xff] }
  0x9d   :  { %959 = vmatpush1.bf16.msra.mxu0 %v4214_v60  ;;  %v315_v60 = vunpack.c.l.s8.bf16 %v227_v56  ;;  %v1453_v56 = vld [vmem:[%s5077_s2 + $0xe8] sm:$0xff] }
  0x9e   :  { %960 = vmatprep.subr.bf16.mxu0 %v4368_v0 }
  0x9f   :  { %3841 = vmatpush3.bf16.msra.mxu1 %v4227_v54 }
  0xa0   :  { %724 = vmatmul.mubr.bf16.gmra.mrb[20].mxu0 %v287_v63  ;;  %852 = vmatmul.mubr.bf16.gmra.mrb[20].mxu1 %v351_v1  ;;  %v384_v63 = vunpack.c.h.s8.bf16 %v260_v47  ;;  %v1429_v1 = vld [vmem:[%s5077_s2 + $0x28] sm:$0xff] }
  0xa1   :  { %731 = vmatprep.mubr.bf16.mxu0 %v292_v2  ;;  %961 = vmatpush1.bf16.msra.mxu0 %v4215_v3  ;;  %v1430_v2 = vld [vmem:[%s5077_s2 + $0x30] sm:$0xff]  ;;  %v232_v3 = vld [vmem:[%s5075_s0 + $0xe8] sm:$0xff] }
  0xa2   :  { %962 = vmatprep.subr.bf16.mxu0 %v4368_v0  ;;  %859 = vmatprep.mubr.bf16.mxu1 %v356_v4  ;;  %v264_v4 = vld [vmem:[%s5075_s0 + $0x1e8] sm:$0xff] }
  0xa3   :  { %3842 = vmatprep.subr.bf16.mxu1 %v4228_v55  ;;  %1515 = vperm.xlu1 %4188, %v1429_v1   ;;  %v1449_v47 = vld [vmem:[%s5077_s2 + $0xc8] sm:$0xff]  ;;  %v4237_v1 = vld [vmem:[#allocation3 + $0x40] sm:$0xff]  }
  0xa4   :  { %3843 = vmatpush3.bf16.msra.mxu1 %v4228_v55  ;;  %1520 = vperm.xlu0 %4187, %v1430_v2   ;;  %v4235_v55 = vld [vmem:[#allocation3 + $0x30] sm:$0xff]   ;;  %v1457_v2 = vld [vmem:[%s5077_s2 + $0x108] sm:$0xff] }
  0xa5   :  { %963 = vmatpush1.bf16.msra.mxu0 %v4216_v6  ;;  %v1432_v6 = vld [vmem:[%s5077_s2 + $0x40] sm:$0xff] }
  0xa6   :  { %964 = vmatprep.subr.bf16.mxu0 %v4368_v0 }
  0xa7   :  { %1525 = vperm.xlu1 %4188, %v1431_v5   ;;  %v1459_v5 = vld [vmem:[%s5077_s2 + $0x118] sm:$0xff] }
  0xa8   :  { %732 = vmatmul.mubr.bf16.gmra.mrb[24].mxu0 %v291_v8  ;;  %860 = vmatmul.mubr.bf16.gmra.mrb[24].mxu1 %v355_v9  ;;  %v383_v8 = vunpack.c.h.s8.bf16 %v259_v57  ;;  %v324_v9 = vunpack.c.l.s8.bf16 %v232_v3  ;;  %v1454_v57 = vld [vmem:[%s5077_s2 + $0xf0] sm:$0xff] }
  0xa9   :  { %739 = vmatprep.mubr.bf16.mxu0 %v296_v10  ;;  %965 = vmatpush1.bf16.msra.mxu0 %v4217_v11  ;;  %v388_v10 = vunpack.c.l.s8.bf16 %v264_v4  ;;  %v1433_v11 = vld [vmem:[%s5077_s2 + $0x48] sm:$0xff] }
  0xaa   :  { %966 = vmatprep.subr.bf16.mxu0 %v4368_v0  ;;  %867 = vmatprep.mubr.bf16.mxu1 %v360_v12  ;;  %v1434_v12 = vld [vmem:[%s5077_s2 + $0x50] sm:$0xff] }
  0xab   :  { %1530 = vperm.xlu0 %4187, %v1432_v6   ;;  %1535 = vperm.xlu1 %4188, %v1433_v11   ;;  %v1460_v6 = vld [vmem:[%s5077_s2 + $0x120] sm:$0xff]  ;;  %v1461_v11 = vld [vmem:[%s5077_s2 + $0x128] sm:$0xff] }
  0xad   :  { %967 = vmatpush1.bf16.msra.mxu0 %v4218_v13  ;;  %v231_v13 = vld [vmem:[%s5075_s0 + $0xe0] sm:$0xff] }
  0xae   :  { %968 = vmatprep.subr.bf16.mxu0 %v4368_v0 }
  0xaf   :  { %1540 = vperm.xlu0 %4187, %v1434_v12   ;;  %1545 = vperm.xlu1 %4188, %v1435_v15   ;;  %v1462_v12 = vld [vmem:[%s5077_s2 + $0x130] sm:$0xff]  ;;  %v1464_v15 = vld [vmem:[%s5077_s2 + $0x140] sm:$0xff] }
  0xb0   :  { %740 = vmatmul.mubr.bf16.gmra.mrb[28].mxu0 %v295_v16  ;;  %868 = vmatmul.mubr.bf16.gmra.mrb[28].mxu1 %v359_v17  ;;  %v1436_v16 = vld [vmem:[%s5077_s2 + $0x60] sm:$0xff]  ;;  %v323_v17 = vunpack.c.l.s8.bf16 %v231_v13 }
  0xb1   :  { %747 = vmatprep.mubr.bf16.mxu0 %v300_v18  ;;  %969 = vmatpush1.bf16.msra.mxu0 %v4219_v19  ;;  %v387_v18 = vunpack.c.l.s8.bf16 %v263_v14  ;;  %v328_v19 = vunpack.c.h.s8.bf16 %v232_v3  ;;  %v1458_v3 = vld [vmem:[%s5077_s2 + $0x110] sm:$0xff] }
  0xb2   :  { %970 = vmatprep.subr.bf16.mxu0 %v4368_v0  ;;  %875 = vmatprep.mubr.bf16.mxu1 %v364_v20  ;;  %v256_v0 = vld [vmem:[%s5075_s0 + $0x1a8] sm:$0xff]  ;;  %v392_v20 = vunpack.c.h.s8.bf16 %v264_v4  ;;  %v213_v4 = vld [vmem:[%s5075_s0 + $0x50] sm:$0xff] }
  0xb3   :  { %v372_v34 = vunpack.c.l.s8.bf16 %v256_v0  ;;  %v376_v42 = vunpack.c.h.s8.bf16 %v256_v0  ;;  %1550 = vperm.xlu0 %4187, %v1436_v16   ;;  %1555 = vperm.xlu1 %4188, %v1437_v21   ;;  %v1442_v0 = vld [vmem:[%s5077_s2 + $0x90] sm:$0xff]  ;;  %v289_v16 = vunpack.c.h.s8.bf16 %v213_v4 }
  0xb4   :  { %v1466_v21 = vld [vmem:[%s5077_s2 + $0x150] sm:$0xff] }
  0xb5   :  { %971 = vmatpush1.bf16.msra.mxu0 %v4220_v22  ;;  %v1438_v22 = vld [vmem:[%s5077_s2 + $0x70] sm:$0xff] }
  0xb7   :  { %1560 = vperm.xlu0 %4187, %v1438_v22   ;;  %v217_v22 = vld [vmem:[%s5075_s0 + $0x70] sm:$0xff] }
  0xb8   :  { %748 = vmatmul.mubr.bf16.gmra.mrb[32].mxu0 %v299_v24  ;;  %876 = vmatmul.mubr.bf16.gmra.mrb[32].mxu1 %v363_v25  ;;  %v1439_v24 = vld [vmem:[%s5077_s2 + $0x78] sm:$0xff]  ;;  %v1440_v25 = vld [vmem:[%s5077_s2 + $0x80] sm:$0xff] }
  0xb9   :  { %755 = vmatprep.mubr.bf16.mxu0 %v304_v26  ;;  %883 = vmatprep.mubr.bf16.mxu1 %v368_v27  ;;  %v327_v26 = vunpack.c.h.s8.bf16 %v231_v13  ;;  %v391_v27 = vunpack.c.h.s8.bf16 %v263_v14  ;;  %v218_v13 = vld [vmem:[%s5075_s0 + $0x78] sm:$0xff] }
  0xba   :  { %1565 = vperm.xlu1 %4188, %v1439_v24   ;;  %v1463_v14 = vld [vmem:[%s5077_s2 + $0x138] sm:$0xff]  ;;  %v1468_v24 = vld [vmem:[%s5077_s2 + $0x160] sm:$0xff] }
  0xbb   :  { %1570 = vperm.xlu0 %4187, %v1440_v25   ;;  %v293_v25 = vunpack.c.l.s8.bf16 %v217_v22 }
  0xbe   :  { %1575 = vperm.xlu1 %4188, %v1441_v30   ;;  %v1470_v30 = vld [vmem:[%s5077_s2 + $0x170] sm:$0xff] }
  0xbf   :  { %1580 = vperm.xlu0 %4187, %v1442_v0   ;;  %v222_v0 = vld [vmem:[%s5075_s0 + $0x98] sm:$0xff] }
  0xc0   :  { %756 = vmatmul.mubr.bf16.gmra.mrb[36].mxu0 %v303_v31  ;;  %884 = vmatmul.mubr.bf16.gmra.mrb[36].mxu1 %v367_v32  ;;  %v205_v31 = vld [vmem:[%s5075_s0 + $0x10] sm:$0xff]  ;;  %v1443_v32 = vld [vmem:[%s5077_s2 + $0x98] sm:$0xff] }
  0xc1   :  { %763 = vmatprep.mubr.bf16.mxu0 %v308_v33  ;;  %891 = vmatprep.mubr.bf16.mxu1 %v372_v34  ;;  %v1444_v33 = vld [vmem:[%s5077_s2 + $0xa0] sm:$0xff]  ;;  %v269_v34 = vunpack.c.l.s8.bf16 %v205_v31  ;;  %v273_v43 = vunpack.c.h.s8.bf16 %v205_v31  ;;  %v1471_v31 = vld [vmem:[%s5077_s2 + $0x178] sm:$0xff] }
  0xc2   :  { %1585 = vperm.xlu1 %4188, %v1443_v32   ;;  %v1472_v32 = vld [vmem:[%s5077_s2 + $0x180] sm:$0xff] }
  0xc3   :  { %1590 = vperm.xlu0 %4187, %v1444_v33   ;;  %v297_v33 = vunpack.c.h.s8.bf16 %v217_v22  ;;  %v234_v22 = vld [vmem:[%s5075_s0 + $0xf8] sm:$0xff] }
  0xc6   :  { %1595 = vperm.xlu1 %4188, %v1445_v38   ;;  %v1474_v38 = vld [vmem:[%s5077_s2 + $0x190] sm:$0xff] }
  0xc8   :  { %764 = vmatmul.mubr.bf16.gmra.mrb[40].mxu0 %v307_v39  ;;  %892 = vmatmul.mubr.bf16.gmra.mrb[40].mxu1 %v371_v40  ;;  %v1446_v39 = vld [vmem:[%s5077_s2 + $0xb0] sm:$0xff]  ;;  %v210_v40 = vld [vmem:[%s5075_s0 + $0x38] sm:$0xff] }
  0xc9   :  { %771 = vmatprep.mubr.bf16.mxu0 %v312_v41  ;;  %899 = vmatprep.mubr.bf16.mxu1 %v376_v42  ;;  %v1447_v41 = vld [vmem:[%s5077_s2 + $0xb8] sm:$0xff]  ;;  %v1448_v42 = vld [vmem:[%s5077_s2 + $0xc0] sm:$0xff]  ;;  %v278_v45 = vunpack.c.l.s8.bf16 %v210_v40  ;;  %v282_v54 = vunpack.c.h.s8.bf16 %v210_v40 }
  0xca   :  { %1600 = vperm.xlu0 %4187, %v1446_v39   ;;  %1605 = vperm.xlu1 %4188, %v1447_v41   ;;  %v221_v39 = vld [vmem:[%s5075_s0 + $0x90] sm:$0xff]  ;;  %v1475_v40 = vld [vmem:[%s5077_s2 + $0x198] sm:$0xff]  ;;  %v1476_v41 = vld [vmem:[%s5077_s2 + $0x1a0] sm:$0xff] }
  0xce   :  { %1610 = vperm.xlu0 %4187, %v1448_v42   ;;  %1615 = vperm.xlu1 %4188, %v1449_v47   ;;  %v301_v42 = vunpack.c.l.s8.bf16 %v221_v39  ;;  %v4255_v47 = vld [vmem:[#allocation6] sm:$0xff]  }
  0xcf   :  { %3908 = vmatprep.subr.bf16.mxu1 %v4255_v47 }
  0xd0   :  { %772 = vmatmul.mubr.bf16.gmra.mrb[44].mxu0 %v311_v49  ;;  %900 = vmatmul.mubr.bf16.gmra.mrb[44].mxu1 %v375_v50  ;;  %v209_v49 = vld [vmem:[%s5075_s0 + $0x30] sm:$0xff]  ;;  %v1451_v50 = vld [vmem:[%s5077_s2 + $0xd8] sm:$0xff] }
  0xd1   :  { %779 = vmatprep.mubr.bf16.mxu0 %v316_v51  ;;  %907 = vmatprep.mubr.bf16.mxu1 %v380_v52  ;;  %v1452_v51 = vld [vmem:[%s5077_s2 + $0xe0] sm:$0xff]  ;;  %v277_v52 = vunpack.c.l.s8.bf16 %v209_v49 }
  0xd2   :  { %1620 = vperm.xlu0 %4187, %v1450_v48   ;;  %1625 = vperm.xlu1 %4188, %v1451_v50   ;;  %v1478_v48 = vld [vmem:[%s5077_s2 + $0x1b0] sm:$0xff]  ;;  %v226_v50 = vld [vmem:[%s5075_s0 + $0xb8] sm:$0xff] }
  0xd6   :  { %1630 = vperm.xlu0 %4187, %v1452_v51   ;;  %1635 = vperm.xlu1 %4188, %v1453_v56   ;;  %v1479_v51 = vld [vmem:[%s5077_s2 + $0x1b8] sm:$0xff]  ;;  %v4249_v56 = vld [vmem:[#allocation3 + $0xa0] sm:$0xff]  }
  0xd8   :  { %780 = vmatmul.mubr.bf16.gmra.mrb[48].mxu0 %v315_v60  ;;  %908 = vmatmul.mubr.bf16.gmra.mrb[48].mxu1 %v379_v61  ;;  %v1456_v60 = vld [vmem:[%s5077_s2 + $0x100] sm:$0xff]  ;;  %v281_v61 = vunpack.c.h.s8.bf16 %v209_v49  ;;  %v4256_v49 = vld [vmem:[#allocation6 + $0x8] sm:$0xff]  }
  0xd9   :  { %787 = vmatprep.mubr.bf16.mxu0 %v320_v62  ;;  %915 = vmatprep.mubr.bf16.mxu1 %v384_v63  ;;  %v4236_v62 = vld [vmem:[#allocation3 + $0x38] sm:$0xff]   ;;  %v286_v63 = vunpack.c.l.s8.bf16 %v214_v58 }
  0xda   :  { %1640 = vperm.xlu0 %4187, %v1454_v57   ;;  %1645 = vperm.xlu1 %4188, %v1455_v59   ;;  %v1481_v57 = vld [vmem:[%s5077_s2 + $0x1c8] sm:$0xff]  ;;  %v1482_v59 = vld [vmem:[%s5077_s2 + $0x1d0] sm:$0xff] }
  0xde   :  { %1650 = vperm.xlu0 %4187, %v1456_v60   ;;  %1655 = vperm.xlu1 %4188, %v1457_v2   ;;  %v225_v60 = vld [vmem:[%s5075_s0 + $0xb0] sm:$0xff]  ;;  %v1484_v2 = vld [vmem:[%s5077_s2 + $0x1e0] sm:$0xff] }
  0xe0   :  { %788 = vmatmul.mubr.bf16.gmra.mrb[52].mxu0 %v319_v7  ;;  %916 = vmatmul.mubr.bf16.gmra.mrb[52].mxu1 %v383_v8  ;;  %v285_v7 = vunpack.c.l.s8.bf16 %v213_v4  ;;  %v4238_v8 = vld [vmem:[#allocation3 + $0x48] sm:$0xff]   ;;  %v4251_v4 = vld [vmem:[#allocation3 + $0xb0] sm:$0xff]  }
  0xe1   :  { %795 = vmatprep.mubr.bf16.mxu0 %v324_v9  ;;  %923 = vmatprep.mubr.bf16.mxu1 %v388_v10  ;;  %v290_v9 = vunpack.c.h.s8.bf16 %v214_v58  ;;  %v4239_v10 = vld [vmem:[#allocation3 + $0x50] sm:$0xff]  }
  0xe2   :  { %1660 = vperm.xlu0 %4187, %v1458_v3   ;;  %1665 = vperm.xlu1 %4188, %v1459_v5   ;;  %v4259_v58 = vld [vmem:[#allocation6 + $0x10] sm:$0xff]   ;;  %v314_v3 = vunpack.c.h.s8.bf16 %v226_v50  ;;  %v1485_v5 = vld [vmem:[%s5077_s2 + $0x1e8] sm:$0xff] }
  0xe6   :  { %1670 = vperm.xlu0 %4187, %v1460_v6   ;;  %1675 = vperm.xlu1 %4188, %v1461_v11   ;;  %v4263_v6 = vld [vmem:[#allocation6 + $0x20] sm:$0xff]   ;;  %v4252_v11 = vld [vmem:[#allocation3 + $0xb8] sm:$0xff]  }
  0xe8   :  { %796 = vmatmul.mubr.bf16.gmra.mrb[56].mxu0 %v323_v17  ;;  %924 = vmatmul.mubr.bf16.gmra.mrb[56].mxu1 %v387_v18  ;;  %v4240_v17 = vld [vmem:[#allocation3 + $0x58] sm:$0xff]   ;;  %v294_v18 = vunpack.c.l.s8.bf16 %v218_v13 }
  0xe9   :  { %803 = vmatprep.mubr.bf16.mxu0 %v328_v19  ;;  %931 = vmatprep.mubr.bf16.mxu1 %v392_v20  ;;  %v4241_v19 = vld [vmem:[#allocation3 + $0x60] sm:$0xff]   ;;  %v1465_v20 = vld [vmem:[%s5077_s2 + $0x148] sm:$0xff] }
  0xea   :  { %1680 = vperm.xlu0 %4187, %v1462_v12   ;;  %1685 = vperm.xlu1 %4188, %v1463_v14   ;;  %v4264_v12 = vld [vmem:[#allocation6 + $0x28] sm:$0xff]   ;;  %v4253_v14 = vld [vmem:[#allocation3 + $0xc0] sm:$0xff]  }
  0xee   :  { %1690 = vperm.xlu0 %4187, %v1464_v15   ;;  %1695 = vperm.xlu1 %4188, %v1465_v20   ;;  %v4267_v15 = vld [vmem:[#allocation6 + $0x30] sm:$0xff]  }
  0xf0   :  { %804 = vmatmul.mubr.bf16.gmra.mrb[60].mxu0 %v327_v26  ;;  %932 = vmatmul.mubr.bf16.gmra.mrb[60].mxu1 %v391_v27  ;;  %v4242_v26 = vld [vmem:[#allocation3 + $0x68] sm:$0xff]   ;;  %v298_v27 = vunpack.c.h.s8.bf16 %v218_v13 }
  0xf1   :  { %972 = vmatprep.mubr.bf16.mxu0 %v270_v28  ;;  %3844 = vmatprep.mubr.bf16.mxu1 %v4229_v29  ;;  %v4243_v28 = vld [vmem:[#allocation3 + $0x70] sm:$0xff]   ;;  %v1469_v29 = vld [vmem:[%s5077_s2 + $0x168] sm:$0xff] }
  0xf2   :  { %1700 = vperm.xlu0 %4187, %v1466_v21   ;;  %1705 = vperm.xlu1 %4188, %v1467_v23   ;;  %v4257_v21 = vld [vmem:[#allocation3 + $0xd0] sm:$0xff]  }
  0xf6   :  { %1710 = vperm.xlu0 %4187, %v1468_v24   ;;  %1715 = vperm.xlu1 %4188, %v1469_v29   ;;  %v4258_v24 = vld [vmem:[#allocation3 + $0xd8] sm:$0xff]   ;;  %v4262_v29 = vld [vmem:[#allocation3 + $0xe8] sm:$0xff]  }
  0xf8   :  { %973 = vmatmul.mubr.bf16.vlgmr.msra.gmra.mrb[0].mxu0 %v269_v34  ;;  %3845 = vmatmul.mubr.bf16.vlgmr.msra.gmra.mrb[64].mxu1 %v4230_v35  ;;  %v4244_v34 = vld [vmem:[#allocation3 + $0x78] sm:$0xff]   ;;  %v302_v35 = vunpack.c.l.s8.bf16 %v222_v0 }
  0xf9   :  { %980 = vmatprep.mubr.bf16.mxu0 %v274_v36  ;;  %3848 = vmatprep.mubr.bf16.mxu1 %v4231_v37  ;;  %v4245_v36 = vld [vmem:[#allocation3 + $0x80] sm:$0xff]   ;;  %v1473_v37 = vld [vmem:[%s5077_s2 + $0x188] sm:$0xff] }
  0xfa   :  { %1720 = vperm.xlu0 %4187, %v1470_v30   ;;  %1725 = vperm.xlu1 %4188, %v1471_v31   ;;  %v330_v30 = vunpack.c.h.s8.bf16 %v234_v22  ;;  %v238_v31 = vld [vmem:[%s5075_s0 + $0x118] sm:$0xff] }
  0xfb   :  { %3909 = vmatpush3.bf16.msra.mxu1 %v4255_v47  ;;  %v245_v47 = vld [vmem:[%s5075_s0 + $0x150] sm:$0xff] }
  0xfc   :  { %3910 = vmatprep.subr.bf16.mxu1 %v4256_v49 }
  0xfe   :  { %1730 = vperm.xlu0 %4187, %v1472_v32   ;;  %1735 = vperm.xlu1 %4188, %v1473_v37   ;;  %v338_v37 = vunpack.c.h.s8.bf16 %v238_v31 }
  0xff   :  { %3911 = vmatpush3.bf16.msra.mxu1 %v4256_v49 }
 0x100   :  { %981 = vmatmul.mubr.bf16.gmra.mrb[4].mxu0 %v273_v43  ;;  %3849 = vmatmul.mubr.bf16.gmra.mrb[68].mxu1 %v4232_v44  ;;  %v4246_v43 = vld [vmem:[#allocation3 + $0x88] sm:$0xff]   ;;  %v306_v44 = vunpack.c.h.s8.bf16 %v222_v0  ;;  %v4265_v0 = vld [vmem:[#allocation3 + $0xf0] sm:$0xff]  }
 0x101   :  { %988 = vmatprep.mubr.bf16.mxu0 %v278_v45  ;;  %3852 = vmatprep.mubr.bf16.mxu1 %v4233_v46  ;;  %v4247_v45 = vld [vmem:[#allocation3 + $0x90] sm:$0xff]   ;;  %v1477_v46 = vld [vmem:[%s5077_s2 + $0x1a8] sm:$0xff] }
 0x102   :  { %1740 = vperm.xlu0 %4187, %v1474_v38   ;;  %1745 = vperm.xlu1 %4188, %v1475_v40   ;;  %v242_v38 = vld [vmem:[%s5075_s0 + $0x138] sm:$0xff] }
 0x103   :  { %3912 = vmatprep.subr.bf16.mxu1 %v4259_v58  ;;  %v342_v40 = vunpack.c.l.s8.bf16 %v242_v38 }
 0x104   :  { %3913 = vmatpush3.bf16.msra.mxu1 %v4259_v58 }
 0x106   :  { %1750 = vperm.xlu0 %4187, %v1476_v41   ;;  %1755 = vperm.xlu1 %4188, %v1477_v46   ;;  %v241_v41 = vld [vmem:[%s5075_s0 + $0x130] sm:$0xff] }
 0x108   :  { %989 = vmatmul.mubr.bf16.gmra.mrb[8].mxu0 %v277_v52  ;;  %3853 = vmatmul.mubr.bf16.gmra.mrb[72].mxu1 %v4234_v53  ;;  %v305_v52 = vunpack.c.h.s8.bf16 %v221_v39  ;;  %v4248_v53 = vld [vmem:[#allocation3 + $0x98] sm:$0xff]  }
 0x109   :  { %996 = vmatprep.mubr.bf16.mxu0 %v282_v54  ;;  %3856 = vmatprep.mubr.bf16.mxu1 %v4235_v55  ;;  %v1480_v54 = vld [vmem:[%s5077_s2 + $0x1c0] sm:$0xff]  ;;  %v310_v55 = vunpack.c.l.s8.bf16 %v226_v50  ;;  %v250_v50 = vld [vmem:[%s5075_s0 + $0x178] sm:$0xff] }
 0x10a   :  { %1760 = vperm.xlu0 %4187, %v1478_v48   ;;  %1765 = vperm.xlu1 %4188, %v1479_v51   ;;  %v349_v48 = vunpack.c.l.s8.bf16 %v245_v47  ;;  %v353_v51 = vunpack.c.h.s8.bf16 %v245_v47 }
 0x10e   :  { %1770 = vperm.xlu0 %4187, %v1480_v54   ;;  %1775 = vperm.xlu1 %4188, %v1481_v57  }
 0x110   :  { %997 = vmatmul.mubr.bf16.gmra.mrb[12].mxu0 %v281_v61  ;;  %3857 = vmatmul.mubr.bf16.gmra.mrb[76].mxu1 %v4236_v62  ;;  %v4260_v61 = vld [vmem:[#allocation6 + $0x18] sm:$0xff]  }
 0x111   :  { %1004 = vmatprep.mubr.bf16.mxu0 %v286_v63  ;;  %3860 = vmatprep.mubr.bf16.mxu1 %v4237_v1  ;;  %v1483_v62 = vld [vmem:[%s5077_s2 + $0x1d8] sm:$0xff]  ;;  %v309_v63 = vunpack.c.l.s8.bf16 %v225_v60  ;;  %v4250_v1 = vld [vmem:[#allocation3 + $0xa8] sm:$0xff]  }
 0x112   :  { %1780 = vperm.xlu0 %4187, %v1482_v59   ;;  %3914 = vmatprep.subr.bf16.mxu1 %v4260_v61 }
 0x113   :  { %1785 = vperm.xlu1 %4188, %v1483_v62   ;;  %3915 = vmatpush3.bf16.msra.mxu1 %v4260_v61 }
 0x114   :  { %3916 = vmatprep.subr.bf16.mxu1 %v4263_v6 }
 0x116   :  { %1790 = vperm.xlu0 %4187, %v1484_v2  }
 0x117   :  { %1795 = vperm.xlu1 %4188, %v1485_v5   ;;  %3917 = vmatpush3.bf16.msra.mxu1 %v4263_v6 }
 0x118   :  { %1005 = vmatmul.mubr.bf16.gmra.mrb[16].mxu0 %v285_v7  ;;  %3861 = vmatmul.mubr.bf16.gmra.mrb[80].mxu1 %v4238_v8  ;;  %v230_v7 = vld [vmem:[%s5075_s0 + $0xd8] sm:$0xff]  ;;  %v1486_v8 = vld [vmem:[%s5077_s2 + $0x1f0] sm:$0xff] }
 0x119   :  { %1012 = vmatprep.mubr.bf16.mxu0 %v290_v9  ;;  %3864 = vmatprep.mubr.bf16.mxu1 %v4239_v10  ;;  %v1487_v9 = vld [vmem:[%s5077_s2 + $0x1f8] sm:$0xff]  ;;  %v313_v10 = vunpack.c.h.s8.bf16 %v225_v60  ;;  %v318_v13 = vunpack.c.l.s8.bf16 %v230_v7  ;;  %v322_v20 = vunpack.c.h.s8.bf16 %v230_v7 }
 0x11a   :  { %1800 = vperm.xlu0 %4187, %v1486_v8   ;;  %3918 = vmatprep.subr.bf16.mxu1 %v4264_v12  ;;  %v254_v60 = vld [vmem:[%s5075_s0 + $0x198] sm:$0xff] }
 0x11b   :  { %1805 = vperm.xlu1 %4188, %v1487_v9   ;;  %3919 = vmatpush3.bf16.msra.mxu1 %v4264_v12  ;;  %v370_v7 = vunpack.c.h.s8.bf16 %v254_v60 }
 0x11c   :  { %3920 = vmatprep.subr.bf16.mxu1 %v4267_v15 }
 0x11f   :  { %3921 = vmatpush3.bf16.msra.mxu1 %v4267_v15 }
 0x120   :  { %1013 = vmatmul.mubr.bf16.gmra.mrb[20].mxu0 %v289_v16  ;;  %3865 = vmatmul.mubr.bf16.gmra.mrb[84].mxu1 %v4240_v17  ;;  %v229_v16 = vld [vmem:[%s5075_s0 + $0xd0] sm:$0xff] }
 0x121   :  { %1020 = vmatprep.mubr.bf16.mxu0 %v294_v18  ;;  %3868 = vmatprep.mubr.bf16.mxu1 %v4241_v19  ;;  %v317_v17 = vunpack.c.l.s8.bf16 %v229_v16  ;;  %v4254_v18 = vld [vmem:[#allocation3 + $0xc8] sm:$0xff]   ;;  %v4268_v19 = vld [vmem:[#allocation6 + $0x38] sm:$0xff]   ;;  %v321_v23 = vunpack.c.h.s8.bf16 %v229_v16 }
 0x122   :  { %3922 = vmatprep.subr.bf16.mxu1 %v4268_v19 }
 0x123   :  { %3923 = vmatpush3.bf16.msra.mxu1 %v4268_v19 }
 0x128   :  { %1021 = vmatmul.mubr.bf16.gmra.mrb[24].mxu0 %v293_v25  ;;  %3869 = vmatmul.mubr.bf16.gmra.mrb[88].mxu1 %v4242_v26  ;;  %v326_v25 = vunpack.c.l.s8.bf16 %v234_v22  ;;  %v4261_v26 = vld [vmem:[#allocation3 + $0xe0] sm:$0xff]  }
 0x129   :  { %1028 = vmatprep.mubr.bf16.mxu0 %v298_v27  ;;  %3872 = vmatprep.mubr.bf16.mxu1 %v4243_v28  ;;  %v233_v27 = vld [vmem:[%s5075_s0 + $0xf0] sm:$0xff] }
 0x12a   :  { %v325_v28 = vunpack.c.l.s8.bf16 %v233_v27  ;;  %v329_v32 = vunpack.c.h.s8.bf16 %v233_v27 }
 0x130   :  { %1029 = vmatmul.mubr.bf16.gmra.mrb[28].mxu0 %v297_v33  ;;  %3873 = vmatmul.mubr.bf16.gmra.mrb[92].mxu1 %v4244_v34  ;;  %v4266_v33 = vld [vmem:[#allocation3 + $0xf8] sm:$0xff]   ;;  %v334_v34 = vunpack.c.l.s8.bf16 %v238_v31 }
 0x131   :  { %1036 = vmatprep.mubr.bf16.mxu0 %v302_v35  ;;  %3876 = vmatprep.mubr.bf16.mxu1 %v4245_v36  ;;  %v237_v35 = vld [vmem:[%s5075_s0 + $0x110] sm:$0xff] }
 0x132   :  { %v333_v36 = vunpack.c.l.s8.bf16 %v237_v35  ;;  %v337_v39 = vunpack.c.h.s8.bf16 %v237_v35 }
 0x138   :  { %1037 = vmatmul.mubr.bf16.gmra.mrb[32].mxu0 %v301_v42  ;;  %3877 = vmatmul.mubr.bf16.gmra.mrb[96].mxu1 %v4246_v43  ;;  %v341_v42 = vunpack.c.l.s8.bf16 %v241_v41  ;;  %v346_v43 = vunpack.c.h.s8.bf16 %v242_v38 }
 0x139   :  { %1044 = vmatprep.mubr.bf16.mxu0 %v306_v44  ;;  %3880 = vmatprep.mubr.bf16.mxu1 %v4247_v45  ;;  %v246_v44 = vld [vmem:[%s5075_s0 + $0x158] sm:$0xff]  ;;  %v345_v45 = vunpack.c.h.s8.bf16 %v241_v41  ;;  %v261_v41 = vld [vmem:[%s5075_s0 + $0x1d0] sm:$0xff] }
 0x13a   :  { %v350_v46 = vunpack.c.l.s8.bf16 %v246_v44  ;;  %v354_v49 = vunpack.c.h.s8.bf16 %v246_v44 }
 0x140   :  { %1045 = vmatmul.mubr.bf16.gmra.mrb[36].mxu0 %v305_v52  ;;  %3881 = vmatmul.mubr.bf16.gmra.mrb[100].mxu1 %v4248_v53  ;;  %v358_v52 = vunpack.c.l.s8.bf16 %v250_v50  ;;  %v249_v53 = vld [vmem:[%s5075_s0 + $0x170] sm:$0xff] }
 0x141   :  { %1052 = vmatprep.mubr.bf16.mxu0 %v310_v55  ;;  %3884 = vmatprep.mubr.bf16.mxu1 %v4249_v56  ;;  %v357_v54 = vunpack.c.l.s8.bf16 %v249_v53  ;;  %v362_v56 = vunpack.c.h.s8.bf16 %v250_v50  ;;  %v361_v61 = vunpack.c.h.s8.bf16 %v249_v53 }
 0x148   :  { %1053 = vmatmul.mubr.bf16.gmra.mrb[40].mxu0 %v309_v63  ;;  %3885 = vmatmul.mubr.bf16.gmra.mrb[104].mxu1 %v4250_v1  ;;  %v366_v63 = vunpack.c.l.s8.bf16 %v254_v60 }
 0x149   :  { %1060 = vmatprep.mubr.bf16.mxu0 %v314_v3  ;;  %3888 = vmatprep.mubr.bf16.mxu1 %v4251_v4  ;;  %v253_v4 = vld [vmem:[%s5075_s0 + $0x190] sm:$0xff] }
 0x14a   :  { %v365_v5 = vunpack.c.l.s8.bf16 %v253_v4  ;;  %v369_v12 = vunpack.c.h.s8.bf16 %v253_v4 }
 0x14b   :  { %v4871_v55 = vpop.f32.mrb[0].mxu1 }
 0x14c   :  { %v815_v57 = vpop.f32.mrb[1].mxu1 }
 0x14d   :  { %v4873_v58 = vpop.f32.mrb[2].mxu1 }
 0x14e   :  { %v818_v59 = vpop.f32.mrb[3].mxu1 }
 0x14f   :  { %v266_v59 = vld [vmem:[%s5075_s0 + $0x1f8] sm:$0xff] }
 0x150   :  { %1061 = vmatmul.mubr.bf16.gmra.mrb[44].mxu0 %v313_v10  ;;  %3889 = vmatmul.mubr.bf16.gmra.mrb[108].mxu1 %v4252_v11  ;;  %v258_v11 = vld [vmem:[%s5075_s0 + $0x1b8] sm:$0xff] }
 0x151   :  { %1068 = vmatprep.mubr.bf16.mxu0 %v318_v13  ;;  %3892 = vmatprep.mubr.bf16.mxu1 %v4253_v14  ;;  %v374_v14 = vunpack.c.l.s8.bf16 %v258_v11  ;;  %v378_v22 = vunpack.c.h.s8.bf16 %v258_v11 }
 0x153   :  { %v4878_v62 = vpop.f32.mrb[4].mxu1 }
 0x154   :  { %v823_v1 = vpop.f32.mrb[5].mxu1 }
 0x155   :  { %v4880_v2 = vpop.f32.mrb[6].mxu1  ;;  %v385_v1 = vunpack.c.h.s8.bf16 %v261_v41 }
 0x156   :  { %v826_v3 = vpop.f32.mrb[7].mxu1 }
 0x158   :  { %1069 = vmatmul.mubr.bf16.gmra.mrb[48].mxu0 %v317_v17  ;;  %3893 = vmatmul.mubr.bf16.gmra.mrb[112].mxu1 %v4254_v18  ;;  %v257_v18 = vld [vmem:[%s5075_s0 + $0x1b0] sm:$0xff] }
 0x159   :  { %1076 = vmatprep.mubr.bf16.mxu0 %v322_v20  ;;  %3896 = vmatprep.mubr.bf16.mxu1 %v4257_v21  ;;  %v373_v19 = vunpack.c.l.s8.bf16 %v257_v18  ;;  %v1491_v21 = vpop.permute.xlu0 %1490 }
 0x15b   :  { %v4885_v6 = vpop.f32.mrb[8].mxu1 }
 0x15c   :  { %v831_v8 = vpop.f32.mrb[9].mxu1 }
 0x15d   :  { %v4887_v9 = vpop.f32.mrb[10].mxu1 }
 0x15e   :  { %v834_v10 = vpop.f32.mrb[11].mxu1 }
 0x160   :  { %1077 = vmatmul.mubr.bf16.gmra.mrb[52].mxu0 %v321_v23  ;;  %3897 = vmatmul.mubr.bf16.gmra.mrb[116].mxu1 %v4258_v24 }
 0x161   :  { %1084 = vmatprep.mubr.bf16.mxu0 %v326_v25  ;;  %3900 = vmatprep.mubr.bf16.mxu1 %v4261_v26  ;;  %v262_v26 = vld [vmem:[%s5075_s0 + $0x1d8] sm:$0xff] }
 0x163   :  { %v4892_v13 = vpop.f32.mrb[12].mxu1 }
 0x164   :  { %v839_v15 = vpop.f32.mrb[13].mxu1 }
 0x165   :  { %v4894_v16 = vpop.f32.mrb[14].mxu1 }
 0x166   :  { %v842_v17 = vpop.f32.mrb[15].mxu1 }
 0x167   :  { %v265_v17 = vld [vmem:[%s5075_s0 + $0x1f0] sm:$0xff] }
 0x168   :  { %1085 = vmatmul.mubr.bf16.gmra.mrb[56].mxu0 %v325_v28  ;;  %3901 = vmatmul.mubr.bf16.gmra.mrb[120].mxu1 %v4262_v29  ;;  %v1496_v28 = vpop.permute.xlu0 %1495 }
 0x169   :  { %1092 = vmatprep.mubr.bf16.mxu0 %v330_v30  ;;  %3904 = vmatprep.mubr.bf16.mxu1 %v4265_v0  ;;  %v377_v30 = vunpack.c.h.s8.bf16 %v257_v18 }
 0x16b   :  { %v4899_v20 = vpop.f32.mrb[16].mxu1 }
 0x16c   :  { %v847_v23 = vpop.f32.mrb[17].mxu1  ;;  %v1511_v57 = vpop.permute.xlu0 %1510 }
 0x16d   :  { %v4901_v24 = vpop.f32.mrb[18].mxu1  ;;  %v389_v23 = vunpack.c.l.s8.bf16 %v265_v17 }
 0x16e   :  { %v850_v25 = vpop.f32.mrb[19].mxu1 }
 0x170   :  { %1093 = vmatmul.mubr.bf16.gmra.mrb[60].mxu0 %v329_v32  ;;  %3905 = vmatmul.mubr.bf16.gmra.mrb[124].mxu1 %v4266_v33  ;;  %v1501_v32 = vpop.permute.xlu1 %1500  ;;  %v382_v33 = vunpack.c.l.s8.bf16 %v262_v26  ;;  %v1521_v18 = vpop.permute.xlu0 %1520 }
 0x171   :  { %1100 = vmatprep.mubr.bf16.mxu0 %v334_v34 }
 0x173   :  { %v4906_v0 = vpop.f32.mrb[20].mxu1 }
 0x178   :  { %1101 = vmatmul.mubr.bf16.gmra.mrb[64].mxu0 %v333_v36 }
 0x179   :  { %1108 = vmatprep.mubr.bf16.mxu0 %v338_v37  ;;  %v855_v37 = vpop.f32.mrb[21].mxu1 }
 0x17a   :  { %v4908_v38 = vpop.f32.mrb[22].mxu1 }
 0x180   :  { %1109 = vmatmul.mubr.bf16.gmra.mrb[68].mxu0 %v337_v39 }
 0x181   :  { %1116 = vmatprep.mubr.bf16.mxu0 %v342_v40  ;;  %v858_v40 = vpop.f32.mrb[23].mxu1 }
 0x182   :  { %v393_v40 = vunpack.c.h.s8.bf16 %v265_v17 }
 0x188   :  { %1117 = vmatmul.mubr.bf16.gmra.mrb[72].mxu0 %v341_v42 }
 0x189   :  { %1124 = vmatprep.mubr.bf16.mxu0 %v346_v43  ;;  %v1506_v43 = vpop.permute.xlu1 %1505 }
 0x18d   :  { %v1516_v60 = vpop.permute.xlu1 %1515 }
 0x190   :  { %1125 = vmatmul.mubr.bf16.gmra.mrb[76].mxu0 %v345_v45  ;;  %v381_v45 = vunpack.c.l.s8.bf16 %v261_v41 }
 0x191   :  { %1132 = vmatprep.mubr.bf16.mxu0 %v350_v46  ;;  %v4913_v46 = vpop.f32.mrb[24].mxu1 }
 0x198   :  { %1133 = vmatmul.mubr.bf16.gmra.mrb[80].mxu0 %v349_v48  ;;  %v386_v48 = vunpack.c.h.s8.bf16 %v262_v26 }
 0x199   :  { %1140 = vmatprep.mubr.bf16.mxu0 %v354_v49  ;;  %v863_v49 = vpop.f32.mrb[25].mxu1 }
 0x19a   :  { %v4915_v53 = vpop.f32.mrb[26].mxu1 }
 0x1a0   :  { %1141 = vmatmul.mubr.bf16.gmra.mrb[84].mxu0 %v353_v51 }
 0x1a1   :  { %1148 = vmatprep.mubr.bf16.mxu0 %v358_v52 }
 0x1a8   :  { %1149 = vmatmul.mubr.bf16.gmra.mrb[88].mxu0 %v357_v54  ;;  %v866_v54 = vpop.f32.mrb[27].mxu1 }
 0x1a9   :  { %1156 = vmatprep.mubr.bf16.mxu0 %v362_v56  ;;  %v4920_v3 = vpop.f32.mrb[28].mxu1 }
 0x1b0   :  { %1157 = vmatmul.mubr.bf16.gmra.mrb[92].mxu0 %v361_v61 }
 0x1b1   :  { %1164 = vmatprep.mubr.bf16.mxu0 %v366_v63 }
 0x1b8   :  { %1165 = vmatmul.mubr.bf16.gmra.mrb[96].mxu0 %v365_v5  ;;  %v390_v5 = vunpack.c.l.s8.bf16 %v266_v59 }
 0x1b9   :  { %1172 = vmatprep.mubr.bf16.mxu0 %v370_v7  ;;  %v871_v7 = vpop.f32.mrb[29].mxu1 }
 0x1c0   :  { %1173 = vmatmul.mubr.bf16.gmra.mrb[100].mxu0 %v369_v12  ;;  %v4922_v12 = vpop.f32.mrb[30].mxu1 }
 0x1c1   :  { %1180 = vmatprep.mubr.bf16.mxu0 %v374_v14  ;;  %v874_v14 = vpop.f32.mrb[31].mxu1 }
 0x1c2   :  { %v4927_v25 = vpop.f32.mrb[32].mxu1 }
 0x1c8   :  { %1181 = vmatmul.mubr.bf16.gmra.mrb[104].mxu0 %v373_v19  ;;  %v1526_v19 = vpop.permute.xlu1 %1525 }
 0x1c9   :  { %1188 = vmatprep.mubr.bf16.mxu0 %v378_v22 }
 0x1cb   :  { %v974_v27 = vpop.f32.mrb[0].mxu0 }
 0x1cc   :  { %v976_v29 = vpop.f32.mrb[1].mxu0  ;;  %v1808_v34 = vmul.f32 %v1491_v21, %v974_v27  ;;  %v394_v27 = vunpack.c.h.s8.bf16 %v266_v59 }
 0x1cd   :  { %v977_v31 = vpop.f32.mrb[2].mxu0 }
 0x1ce   :  { %v1809_v35 = vmul.f32 %v1496_v28, %v977_v31  ;;  %v979_v36 = vpop.f32.mrb[3].mxu0  ;;  %v879_v28 = vpop.f32.mrb[33].mxu1 }
 0x1cf   :  { %v1536_v36 = vpop.permute.xlu1 %1535 }
 0x1d0   :  { %v1872_v39 = vpack.c.bf16 %v1809_v35, %v1808_v34  ;;  %1189 = vmatmul.mubr.bf16.gmra.mrb[108].mxu0 %v377_v30  ;;  %v1531_v35 = vpop.permute.xlu0 %1530 }
 0x1d1   :  { %1196 = vmatprep.mubr.bf16.mxu0 %v382_v33 }
 0x1d2   :  { %3924 = vmatprep.mubr.bf16.mxu1 %v1872_v39 }
 0x1d3   :  { %v982_v42 = vpop.f32.mrb[4].mxu0 }
 0x1d4   :  { %v984_v44 = vpop.f32.mrb[5].mxu0  ;;  %v1810_v50 = vmul.f32 %v1501_v32, %v982_v42  ;;  %v4929_v32 = vpop.f32.mrb[34].mxu1 }
 0x1d5   :  { %v985_v47 = vpop.f32.mrb[6].mxu0  ;;  %v882_v33 = vpop.f32.mrb[35].mxu1 }
 0x1d6   :  { %v1811_v51 = vmul.f32 %v1506_v43, %v985_v47  ;;  %v987_v52 = vpop.f32.mrb[7].mxu0  ;;  %v4931_v41 = vpop.f32.mrb[36].mxu1 }
 0x1d7   :  { %v887_v43 = vpop.f32.mrb[37].mxu1  ;;  %v1546_v52 = vpop.permute.xlu1 %1545 }
 0x1d8   :  { %v1873_v56 = vpack.c.bf16 %v1811_v51, %v1810_v50  ;;  %1197 = vmatmul.mubr.bf16.gmra.mrb[112].mxu0 %v381_v45  ;;  %v1541_v51 = vpop.permute.xlu0 %1540 }
 0x1d9   :  { %1204 = vmatprep.mubr.bf16.mxu0 %v386_v48  ;;  %v4933_v48 = vpop.f32.mrb[38].mxu1 }
 0x1da   :  { %3925 = vmatmul.mubr.bf16.vlgmr.msra.gmra.mrb[64].mxu1 %v1873_v56  ;;  %v890_v49 = vpop.f32.mrb[39].mxu1 }
 0x1db   :  { %v990_v61 = vpop.f32.mrb[8].mxu0 }
 0x1dc   :  { %v992_v63 = vpop.f32.mrb[9].mxu0  ;;  %v1812_v8 = vmul.f32 %v1511_v57, %v990_v61  ;;  %v4935_v57 = vpop.f32.mrb[40].mxu1 }
 0x1dd   :  { %v993_v4 = vpop.f32.mrb[10].mxu0 }
 0x1de   :  { %v1813_v10 = vmul.f32 %v1516_v60, %v993_v4  ;;  %v995_v11 = vpop.f32.mrb[11].mxu0  ;;  %v895_v60 = vpop.f32.mrb[41].mxu1 }
 0x1df   :  { %v4937_v4 = vpop.f32.mrb[42].mxu1 }
 0x1e0   :  { %v1874_v15 = vpack.c.bf16 %v1813_v10, %v1812_v8  ;;  %1205 = vmatmul.mubr.bf16.gmra.mrb[116].mxu0 %v385_v1  ;;  %v1551_v8 = vpop.permute.xlu0 %1550  ;;  %v1556_v10 = vpop.permute.xlu1 %1555 }
 0x1e1   :  { %1212 = vmatprep.mubr.bf16.mxu0 %v390_v5  ;;  %v898_v5 = vpop.f32.mrb[43].mxu1 }
 0x1e2   :  { %3928 = vmatprep.mubr.bf16.mxu1 %v1874_v15  ;;  %v4939_v15 = vpop.f32.mrb[44].mxu1 }
 0x1e3   :  { %v998_v21 = vpop.f32.mrb[12].mxu0 }
 0x1e4   :  { %v1000_v22 = vpop.f32.mrb[13].mxu0  ;;  %v1814_v29 = vmul.f32 %v1521_v18, %v998_v21  ;;  %v903_v18 = vpop.f32.mrb[45].mxu1 }
 0x1e5   :  { %v1001_v26 = vpop.f32.mrb[14].mxu0  ;;  %v1561_v28 = vpop.permute.xlu0 %1560 }
 0x1e6   :  { %v1815_v30 = vmul.f32 %v1526_v19, %v1001_v26  ;;  %v1003_v31 = vpop.f32.mrb[15].mxu0 }
 0x1e8   :  { %v1875_v34 = vpack.c.bf16 %v1815_v30, %v1814_v29  ;;  %1213 = vmatmul.mubr.bf16.gmra.mrb[120].mxu0 %v389_v23  ;;  %v4941_v23 = vpop.f32.mrb[46].mxu1  ;;  %v1566_v29 = vpop.permute.xlu1 %1565 }
 0x1e9   :  { %1220 = vmatprep.mubr.bf16.mxu0 %v394_v27  ;;  %v906_v26 = vpop.f32.mrb[47].mxu1 }
 0x1ea   :  { %3929 = vmatmul.mubr.bf16.gmra.mrb[68].mxu1 %v1875_v34  ;;  %v4943_v33 = vpop.f32.mrb[48].mxu1 }
 0x1eb   :  { %v1006_v37 = vpop.f32.mrb[16].mxu0 }
 0x1ec   :  { %v1008_v39 = vpop.f32.mrb[17].mxu0  ;;  %v1816_v44 = vmul.f32 %v1531_v35, %v1006_v37  ;;  %v911_v35 = vpop.f32.mrb[49].mxu1 }
 0x1ed   :  { %v1009_v42 = vpop.f32.mrb[18].mxu0 }
 0x1ee   :  { %v1817_v45 = vmul.f32 %v1536_v36, %v1009_v42  ;;  %v1011_v47 = vpop.f32.mrb[19].mxu0 }
 0x1f0   :  { %v1876_v50 = vpack.c.bf16 %v1817_v45, %v1816_v44  ;;  %1221 = vmatmul.mubr.bf16.gmra.mrb[124].mxu0 %v393_v40  ;;  %v4945_v40 = vpop.f32.mrb[50].mxu1  ;;  %v1571_v44 = vpop.permute.xlu0 %1570 }
 0x1f1   :  { %v914_v42 = vpop.f32.mrb[51].mxu1  ;;  %v1576_v45 = vpop.permute.xlu1 %1575 }
 0x1f2   :  { %3932 = vmatprep.mubr.bf16.mxu1 %v1876_v50  ;;  %v4947_v50 = vpop.f32.mrb[52].mxu1 }
 0x1f3   :  { %v1014_v54 = vpop.f32.mrb[20].mxu0 }
 0x1f4   :  { %v1016_v56 = vpop.f32.mrb[21].mxu0  ;;  %v1818_v61 = vmul.f32 %v1541_v51, %v1014_v54 }
 0x1f5   :  { %v1017_v59 = vpop.f32.mrb[22].mxu0  ;;  %v1586_v5 = vpop.permute.xlu1 %1585 }
 0x1f6   :  { %v1819_v63 = vmul.f32 %v1546_v52, %v1017_v59  ;;  %v1019_v1 = vpop.f32.mrb[23].mxu0  ;;  %v919_v52 = vpop.f32.mrb[53].mxu1 }
 0x1f7   :  { %v4949_v60 = vpop.f32.mrb[54].mxu1  ;;  %v1581_v1 = vpop.permute.xlu0 %1580 }
 0x1f8   :  { %v1877_v7 = vpack.c.bf16 %v1819_v63, %v1818_v61  ;;  %v922_v61 = vpop.f32.mrb[55].mxu1 }
 0x1fa   :  { %3933 = vmatmul.mubr.bf16.gmra.mrb[72].mxu1 %v1877_v7 }
 0x1fb   :  { %v1022_v11 = vpop.f32.mrb[24].mxu0 }
 0x1fc   :  { %v1024_v14 = vpop.f32.mrb[25].mxu0  ;;  %v1820_v19 = vmul.f32 %v1551_v8, %v1022_v11 }
 0x1fd   :  { %v1025_v17 = vpop.f32.mrb[26].mxu0 }
 0x1fe   :  { %v1821_v21 = vmul.f32 %v1556_v10, %v1025_v17  ;;  %v1027_v22 = vpop.f32.mrb[27].mxu0  ;;  %v4951_v10 = vpop.f32.mrb[56].mxu1 }
 0x1ff   :  { %v927_v14 = vpop.f32.mrb[57].mxu1 }
 0x200   :  { %v1878_v27 = vpack.c.bf16 %v1821_v21, %v1820_v19  ;;  %v4953_v21 = vpop.f32.mrb[58].mxu1 }
 0x201   :  { %v930_v22 = vpop.f32.mrb[59].mxu1 }
 0x202   :  { %3936 = vmatprep.mubr.bf16.mxu1 %v1878_v27  ;;  %v1591_v27 = vpop.permute.xlu0 %1590 }
 0x203   :  { %v1030_v30 = vpop.f32.mrb[28].mxu0 }
 0x204   :  { %v1032_v31 = vpop.f32.mrb[29].mxu0  ;;  %v1822_v36 = vmul.f32 %v1561_v28, %v1030_v30  ;;  %v1596_v28 = vpop.permute.xlu1 %1595 }
 0x205   :  { %v1033_v34 = vpop.f32.mrb[30].mxu0  ;;  %v4955_v31 = vpop.f32.mrb[60].mxu1 }
 0x206   :  { %v1823_v37 = vmul.f32 %v1566_v29, %v1033_v34  ;;  %v1035_v39 = vpop.f32.mrb[31].mxu0  ;;  %v935_v35 = vpop.f32.mrb[61].mxu1 }
 0x207   :  { %v4957_v42 = vpop.f32.mrb[62].mxu1 }
 0x208   :  { %v1879_v43 = vpack.c.bf16 %v1823_v37, %v1822_v36 }
 0x20a   :  { %3937 = vmatmul.mubr.bf16.gmra.mrb[76].mxu1 %v1879_v43  ;;  %v938_v43 = vpop.f32.mrb[63].mxu1 }
 0x20b   :  { %v1038_v47 = vpop.f32.mrb[32].mxu0 }
 0x20c   :  { %v1040_v49 = vpop.f32.mrb[33].mxu0  ;;  %v1824_v54 = vmul.f32 %v1571_v44, %v1038_v47  ;;  %v1601_v47 = vpop.permute.xlu0 %1600 }
 0x20d   :  { %v1041_v51 = vpop.f32.mrb[34].mxu0 }
 0x20e   :  { %v1825_v56 = vmul.f32 %v1576_v45, %v1041_v51  ;;  %v1043_v59 = vpop.f32.mrb[35].mxu0  ;;  %v1606_v51 = vpop.permute.xlu1 %1605 }
 0x210   :  { %v1880_v63 = vpack.c.bf16 %v1825_v56, %v1824_v54 }
 0x212   :  { %3940 = vmatprep.mubr.bf16.mxu1 %v1880_v63 }
 0x213   :  { %v1046_v7 = vpop.f32.mrb[36].mxu0 }
 0x214   :  { %v1048_v8 = vpop.f32.mrb[37].mxu0  ;;  %v1826_v17 = vmul.f32 %v1581_v1, %v1046_v7  ;;  %v1611_v1 = vpop.permute.xlu0 %1610 }
 0x215   :  { %v1049_v11 = vpop.f32.mrb[38].mxu0  ;;  %v1616_v7 = vpop.permute.xlu1 %1615 }
 0x216   :  { %v1827_v18 = vmul.f32 %v1586_v5, %v1049_v11  ;;  %v1051_v19 = vpop.f32.mrb[39].mxu0 }
 0x218   :  { %v1881_v26 = vpack.c.bf16 %v1827_v18, %v1826_v17  ;;  %v1621_v22 = vpop.permute.xlu0 %1620 }
 0x21a   :  { %3941 = vmatmul.mubr.bf16.gmra.mrb[80].mxu1 %v1881_v26 }
 0x21b   :  { %v1054_v29 = vpop.f32.mrb[40].mxu0 }
 0x21c   :  { %v1056_v30 = vpop.f32.mrb[41].mxu0  ;;  %v1828_v36 = vmul.f32 %v1591_v27, %v1054_v29  ;;  %v1626_v27 = vpop.permute.xlu1 %1625 }
 0x21d   :  { %v1057_v34 = vpop.f32.mrb[42].mxu0 }
 0x21e   :  { %v1829_v37 = vmul.f32 %v1596_v28, %v1057_v34  ;;  %v1059_v39 = vpop.f32.mrb[43].mxu0 }
 0x220   :  { %v1882_v44 = vpack.c.bf16 %v1829_v37, %v1828_v36  ;;  %v1631_v37 = vpop.permute.xlu0 %1630  ;;  %v1636_v43 = vpop.permute.xlu1 %1635 }
 0x222   :  { %3944 = vmatprep.mubr.bf16.mxu1 %v1882_v44 }
 0x223   :  { %v1062_v45 = vpop.f32.mrb[44].mxu0 }
 0x224   :  { %v1064_v49 = vpop.f32.mrb[45].mxu0  ;;  %v1830_v54 = vmul.f32 %v1601_v47, %v1062_v45 }
 0x225   :  { %v1065_v52 = vpop.f32.mrb[46].mxu0 }
 0x226   :  { %v1831_v56 = vmul.f32 %v1606_v51, %v1065_v52  ;;  %v1067_v59 = vpop.f32.mrb[47].mxu0 }
 0x227   :  { %v1646_v59 = vpop.permute.xlu1 %1645 }
 0x228   :  { %v1883_v61 = vpack.c.bf16 %v1831_v56, %v1830_v54  ;;  %v1641_v54 = vpop.permute.xlu0 %1640 }
 0x22a   :  { %3945 = vmatmul.mubr.bf16.gmra.mrb[84].mxu1 %v1883_v61 }
 0x22b   :  { %v1070_v63 = vpop.f32.mrb[48].mxu0 }
 0x22c   :  { %v1072_v5 = vpop.f32.mrb[49].mxu0  ;;  %v1832_v11 = vmul.f32 %v1611_v1, %v1070_v63 }
 0x22d   :  { %v1073_v8 = vpop.f32.mrb[50].mxu0 }
 0x22e   :  { %v1833_v14 = vmul.f32 %v1616_v7, %v1073_v8  ;;  %v1075_v17 = vpop.f32.mrb[51].mxu0 }
 0x230   :  { %v1884_v18 = vpack.c.bf16 %v1833_v14, %v1832_v11 }
 0x232   :  { %3948 = vmatprep.mubr.bf16.mxu1 %v1884_v18 }
 0x233   :  { %v1078_v19 = vpop.f32.mrb[52].mxu0 }
 0x234   :  { %v1080_v26 = vpop.f32.mrb[53].mxu0  ;;  %v1834_v29 = vmul.f32 %v1621_v22, %v1078_v19  ;;  %v1651_v22 = vpop.permute.xlu0 %1650 }
 0x235   :  { %v1081_v28 = vpop.f32.mrb[54].mxu0  ;;  %v1656_v26 = vpop.permute.xlu1 %1655 }
 0x236   :  { %v1835_v30 = vmul.f32 %v1626_v27, %v1081_v28  ;;  %v1083_v34 = vpop.f32.mrb[55].mxu0 }
 0x238   :  { %v1885_v35 = vpack.c.bf16 %v1835_v30, %v1834_v29 }
 0x23a   :  { %3949 = vmatmul.mubr.bf16.gmra.mrb[88].mxu1 %v1885_v35 }
 0x23b   :  { %v1086_v36 = vpop.f32.mrb[56].mxu0 }
 0x23c   :  { %v1088_v39 = vpop.f32.mrb[57].mxu0  ;;  %v1836_v45 = vmul.f32 %v1631_v37, %v1086_v36 }
 0x23d   :  { %v1089_v44 = vpop.f32.mrb[58].mxu0 }
 0x23e   :  { %v1837_v47 = vmul.f32 %v1636_v43, %v1089_v44  ;;  %v1091_v49 = vpop.f32.mrb[59].mxu0  ;;  %v1666_v43 = vpop.permute.xlu1 %1665 }
 0x240   :  { %v1886_v51 = vpack.c.bf16 %v1837_v47, %v1836_v45 }
 0x242   :  { %3952 = vmatprep.mubr.bf16.mxu1 %v1886_v51 }
 0x243   :  { %v1094_v52 = vpop.f32.mrb[60].mxu0 }
 0x244   :  { %v1096_v56 = vpop.f32.mrb[61].mxu0  ;;  %v1838_v63 = vmul.f32 %v1641_v54, %v1094_v52 }
 0x245   :  { %v1097_v61 = vpop.f32.mrb[62].mxu0 }
 0x246   :  { %v1839_v1 = vmul.f32 %v1646_v59, %v1097_v61  ;;  %v1099_v5 = vpop.f32.mrb[63].mxu0  ;;  %v1676_v59 = vpop.permute.xlu1 %1675 }
 0x248   :  { %v1887_v7 = vpack.c.bf16 %v1839_v1, %v1838_v63 }
 0x24a   :  { %3953 = vmatmul.mubr.bf16.gmra.mrb[92].mxu1 %v1887_v7 }
 0x24b   :  { %v1102_v8 = vpop.f32.mrb[64].mxu0 }
 0x24c   :  { %v1103_v11 = vadd.f32 %v1102_v8, %v4871_v55  ;;  %v1104_v14 = vpop.f32.mrb[65].mxu0  ;;  %v1661_v55 = vpop.permute.xlu0 %1660 }
 0x24d   :  { %v1105_v17 = vpop.f32.mrb[66].mxu0 }
 0x24e   :  { %v1106_v18 = vadd.f32 %v1105_v17, %v4873_v58  ;;  %v1107_v19 = vpop.f32.mrb[67].mxu0  ;;  %v1840_v27 = vmul.f32 %v1651_v22, %v1103_v11  ;;  %v1686_v17 = vpop.permute.xlu1 %1685 }
 0x250   :  { %v1841_v28 = vmul.f32 %v1656_v26, %v1106_v18  ;;  %v1671_v56 = vpop.permute.xlu0 %1670 }
 0x252   :  { %v1888_v29 = vpack.c.bf16 %v1841_v28, %v1840_v27 }
 0x253   :  { %v1110_v30 = vpop.f32.mrb[68].mxu0 }
 0x254   :  { %v1111_v34 = vadd.f32 %v1110_v30, %v4878_v62  ;;  %v1112_v35 = vpop.f32.mrb[69].mxu0  ;;  %3956 = vmatprep.mubr.bf16.mxu1 %v1888_v29  ;;  %v1681_v14 = vpop.permute.xlu0 %1680 }
 0x255   :  { %v1113_v36 = vpop.f32.mrb[70].mxu0 }
 0x256   :  { %v1114_v37 = vadd.f32 %v1113_v36, %v4880_v2  ;;  %v1115_v39 = vpop.f32.mrb[71].mxu0  ;;  %v1842_v44 = vmul.f32 %v1661_v55, %v1111_v34  ;;  %v1696_v34 = vpop.permute.xlu1 %1695 }
 0x258   :  { %v1843_v45 = vmul.f32 %v1666_v43, %v1114_v37  ;;  %v1691_v30 = vpop.permute.xlu0 %1690 }
 0x25a   :  { %v1889_v58 = vpack.c.bf16 %v1843_v45, %v1842_v44 }
 0x25b   :  { %v1118_v47 = vpop.f32.mrb[72].mxu0 }
 0x25c   :  { %v1119_v49 = vadd.f32 %v1118_v47, %v4885_v6  ;;  %v1120_v51 = vpop.f32.mrb[73].mxu0  ;;  %3957 = vmatmul.mubr.bf16.gmra.mrb[96].mxu1 %v1889_v58  ;;  %v1701_v45 = vpop.permute.xlu0 %1700 }
 0x25d   :  { %v1121_v52 = vpop.f32.mrb[74].mxu0  ;;  %v1706_v58 = vpop.permute.xlu1 %1705 }
 0x25e   :  { %v1122_v54 = vadd.f32 %v1121_v52, %v4887_v9  ;;  %v1123_v62 = vpop.f32.mrb[75].mxu0  ;;  %v1844_v61 = vmul.f32 %v1671_v56, %v1119_v49 }
 0x260   :  { %v1845_v63 = vmul.f32 %v1676_v59, %v1122_v54  ;;  %v1711_v59 = vpop.permute.xlu0 %1710 }
 0x262   :  { %v1890_v2 = vpack.c.bf16 %v1845_v63, %v1844_v61  ;;  %v1716_v61 = vpop.permute.xlu1 %1715 }
 0x263   :  { %v1126_v1 = vpop.f32.mrb[76].mxu0 }
 0x264   :  { %v1127_v5 = vadd.f32 %v1126_v1, %v4892_v13  ;;  %v1128_v7 = vpop.f32.mrb[77].mxu0  ;;  %3960 = vmatprep.mubr.bf16.mxu1 %v1890_v2 }
 0x265   :  { %v1129_v8 = vpop.f32.mrb[78].mxu0 }
 0x266   :  { %v1130_v11 = vadd.f32 %v1129_v8, %v4894_v16  ;;  %v1131_v6 = vpop.f32.mrb[79].mxu0  ;;  %v1846_v18 = vmul.f32 %v1681_v14, %v1127_v5  ;;  %v1726_v14 = vpop.permute.xlu1 %1725 }
 0x267   :  { %v1721_v6 = vpop.permute.xlu0 %1720 }
 0x268   :  { %v1847_v19 = vmul.f32 %v1686_v17, %v1130_v11 }
 0x26a   :  { %v1891_v9 = vpack.c.bf16 %v1847_v19, %v1846_v18 }
 0x26b   :  { %v1134_v22 = vpop.f32.mrb[80].mxu0 }
 0x26c   :  { %v1135_v26 = vadd.f32 %v1134_v22, %v4899_v20  ;;  %v1136_v27 = vpop.f32.mrb[81].mxu0  ;;  %3961 = vmatmul.mubr.bf16.gmra.mrb[100].mxu1 %v1891_v9 }
 0x26d   :  { %v1137_v28 = vpop.f32.mrb[82].mxu0 }
 0x26e   :  { %v1138_v29 = vadd.f32 %v1137_v28, %v4901_v24  ;;  %v1139_v13 = vpop.f32.mrb[83].mxu0  ;;  %v1848_v35 = vmul.f32 %v1691_v30, %v1135_v26  ;;  %v1731_v28 = vpop.permute.xlu0 %1730 }
 0x270   :  { %v1849_v36 = vmul.f32 %v1696_v34, %v1138_v29  ;;  %v1736_v29 = vpop.permute.xlu1 %1735 }
 0x272   :  { %v1892_v16 = vpack.c.bf16 %v1849_v36, %v1848_v35 }
 0x273   :  { %v1142_v37 = vpop.f32.mrb[84].mxu0 }
 0x274   :  { %v1143_v39 = vadd.f32 %v1142_v37, %v4906_v0  ;;  %v1144_v55 = vpop.f32.mrb[85].mxu0  ;;  %3964 = vmatprep.mubr.bf16.mxu1 %v1892_v16 }
 0x275   :  { %v1145_v43 = vpop.f32.mrb[86].mxu0  ;;  %v1746_v55 = vpop.permute.xlu1 %1745 }
 0x276   :  { %v1146_v44 = vadd.f32 %v1145_v43, %v4908_v38  ;;  %v1147_v20 = vpop.f32.mrb[87].mxu0  ;;  %v1850_v47 = vmul.f32 %v1701_v45, %v1143_v39  ;;  %v1741_v39 = vpop.permute.xlu0 %1740 }
 0x278   :  { %v1851_v49 = vmul.f32 %v1706_v58, %v1146_v44 }
 0x27a   :  { %v1893_v24 = vpack.c.bf16 %v1851_v49, %v1850_v47 }
 0x27b   :  { %v1150_v51 = vpop.f32.mrb[88].mxu0 }
 0x27c   :  { %v1151_v52 = vadd.f32 %v1150_v51, %v4913_v46  ;;  %v1152_v54 = vpop.f32.mrb[89].mxu0  ;;  %3965 = vmatmul.mubr.bf16.gmra.mrb[104].mxu1 %v1893_v24  ;;  %v1751_v24 = vpop.permute.xlu0 %1750 }
 0x27d   :  { %v1153_v62 = vpop.f32.mrb[90].mxu0  ;;  %v1756_v51 = vpop.permute.xlu1 %1755 }
 0x27e   :  { %v1154_v56 = vadd.f32 %v1153_v62, %v4915_v53  ;;  %v1155_v0 = vpop.f32.mrb[91].mxu0  ;;  %v1852_v63 = vmul.f32 %v1711_v59, %v1151_v52 }
 0x280   :  { %v1853_v2 = vmul.f32 %v1716_v61, %v1154_v56  ;;  %v1761_v61 = vpop.permute.xlu0 %1760 }
 0x282   :  { %v1894_v38 = vpack.c.bf16 %v1853_v2, %v1852_v63  ;;  %v1766_v2 = vpop.permute.xlu1 %1765 }
 0x283   :  { %v1158_v1 = vpop.f32.mrb[92].mxu0 }
 0x284   :  { %v1159_v5 = vadd.f32 %v1158_v1, %v4920_v3  ;;  %v1160_v7 = vpop.f32.mrb[93].mxu0  ;;  %3968 = vmatprep.mubr.bf16.mxu1 %v1894_v38 }
 0x285   :  { %v1161_v8 = vpop.f32.mrb[94].mxu0  ;;  %v4986_v7 = vld [vmem:[%s5080_s5] ss:$0 sm:$0xff]  ;;  %s4369_s5 = smov [#allocation9]  }
 0x286   :  { %v1162_v11 = vadd.f32 %v1161_v8, %v4922_v12  ;;  %v1163_v46 = vpop.f32.mrb[95].mxu0  ;;  %v1854_v17 = vmul.f32 %v1721_v6, %v1159_v5  ;;  %v1771_v8 = vpop.permute.xlu0 %1770  ;;  %s3331_s15 = sshll.u32 %s4369_s5, 4  ;;  %s3332_s15 = int_to_ptr.vmem [resolvable:$true] %s3331_s15 }
 0x287   :  { %s4335_s16 = scalar_lea.vmem %s3332_s15, 4096  ;;  %p4340_p11 = scmp.lt.s32.totalorder %s3332_s15, %s3332_s15 }
 0x288   :  { %v1855_v18 = vmul.f32 %v1726_v14, %v1162_v11  ;;  %p4336_p10 = scmp.ne.s32.totalorder %s3332_s15, %s4335_s16  ;;  %p4341_p12 = scmp.lt.s32.totalorder %s4335_s16, %s4335_s16 }
 0x28a   :  { %v1895_v53 = vpack.c.bf16 %v1855_v18, %v1854_v17  ;;  %p4342_p13 = por %p4341_p12, %p4340_p11 }
 0x28b   :  { %v1166_v19 = vpop.f32.mrb[96].mxu0 }
 0x28c   :  { %v1167_v9 = vadd.f32 %v1166_v19, %v4927_v25  ;;  %v1168_v22 = vpop.f32.mrb[97].mxu0  ;;  %3969 = vmatmul.mubr.bf16.gmra.mrb[108].mxu1 %v1895_v53  ;;  %v1776_v53 = vpop.permute.xlu1 %1775  ;;  %p4343_p0 = pnand %p4342_p13, %p4336_p10 }
 0x28d   :  { %v1169_v26 = vpop.f32.mrb[98].mxu0 }
 0x28e   :  { %v1170_v27 = vadd.f32 %v1169_v26, %v4929_v32  ;;  %v1171_v3 = vpop.f32.mrb[99].mxu0  ;;  %v1856_v13 = vmul.f32 %v1731_v28, %v1167_v9 }
 0x290   :  { %v1857_v30 = vmul.f32 %v1736_v29, %v1170_v27 }
 0x292   :  { %v1896_v12 = vpack.c.bf16 %v1857_v30, %v1856_v13 }
 0x293   :  { %v1174_v34 = vpop.f32.mrb[100].mxu0 }
 0x294   :  { %v1175_v35 = vadd.f32 %v1174_v34, %v4931_v41  ;;  %v1176_v36 = vpop.f32.mrb[101].mxu0  ;;  %3972 = vmatprep.mubr.bf16.mxu1 %v1896_v12 }
 0x295   :  { %v1177_v16 = vpop.f32.mrb[102].mxu0 }
 0x296   :  { %v1178_v37 = vadd.f32 %v1177_v16, %v4933_v48  ;;  %v1179_v25 = vpop.f32.mrb[103].mxu0  ;;  %v1858_v43 = vmul.f32 %v1741_v39, %v1175_v35 }
 0x297   :  { %v1781_v25 = vpop.permute.xlu0 %1780 }
 0x298   :  { %v1859_v44 = vmul.f32 %v1746_v55, %v1178_v37 }
 0x29a   :  { %v1897_v32 = vpack.c.bf16 %v1859_v44, %v1858_v43  ;;  %v1786_v43 = vpop.permute.xlu1 %1785 }
 0x29b   :  { %v1182_v20 = vpop.f32.mrb[104].mxu0 }
 0x29c   :  { %v1183_v45 = vadd.f32 %v1182_v20, %v4935_v57  ;;  %v1184_v58 = vpop.f32.mrb[105].mxu0  ;;  %3973 = vmatmul.mubr.bf16.gmra.mrb[112].mxu1 %v1897_v32 }
 0x29d   :  { %v1185_v47 = vpop.f32.mrb[106].mxu0  ;;  %v1791_v58 = vpop.permute.xlu0 %1790 }
 0x29e   :  { %v1186_v49 = vadd.f32 %v1185_v47, %v4937_v4  ;;  %v1187_v41 = vpop.f32.mrb[107].mxu0  ;;  %v1860_v52 = vmul.f32 %v1751_v24, %v1183_v45 }
 0x2a0   :  { %v1861_v54 = vmul.f32 %v1756_v51, %v1186_v49 }
 0x2a2   :  { %v1898_v48 = vpack.c.bf16 %v1861_v54, %v1860_v52  ;;  %v1796_v54 = vpop.permute.xlu1 %1795 }
 0x2a3   :  { %v1190_v62 = vpop.f32.mrb[108].mxu0 }
 0x2a4   :  { %v1191_v56 = vadd.f32 %v1190_v62, %v4939_v15  ;;  %v1192_v0 = vpop.f32.mrb[109].mxu0  ;;  %3976 = vmatprep.mubr.bf16.mxu1 %v1898_v48 }
 0x2a5   :  { %v1193_v59 = vpop.f32.mrb[110].mxu0 }
 0x2a6   :  { %v1194_v57 = vadd.f32 %v1193_v59, %v4941_v23  ;;  %v1195_v63 = vpop.f32.mrb[111].mxu0  ;;  %v1862_v38 = vmul.f32 %v1761_v61, %v1191_v56 }
 0x2a8   :  { %v1863_v1 = vmul.f32 %v1766_v2, %v1194_v57 }
 0x2aa   :  { %v1899_v4 = vpack.c.bf16 %v1863_v1, %v1862_v38 }
 0x2ab   :  { %v1198_v5 = vpop.f32.mrb[112].mxu0 }
 0x2ac   :  { %v1199_v15 = vadd.f32 %v1198_v5, %v4943_v33  ;;  %v1200_v11 = vpop.f32.mrb[113].mxu0  ;;  %3977 = vmatmul.mubr.bf16.gmra.mrb[116].mxu1 %v1899_v4 }
 0x2ad   :  { %v1201_v46 = vpop.f32.mrb[114].mxu0  ;;  %v3926_v6 = vpop.f32.mrb[64].mxu1 }
 0x2ae   :  { %v1202_v23 = vadd.f32 %v1201_v46, %v4945_v40  ;;  %v2880_v14 = vadd.f32 %v3926_v6, %v4986_v7  ;;  %v1203_v17 = vpop.f32.mrb[115].mxu0  ;;  %v2616_v18 = vpop.f32.mrb[65].mxu1  ;;  %v1864_v22 = vmul.f32 %v1771_v8, %v1199_v15 }
 0x2af   :  { %v2878_v19 = vadd.f32 %v4986_v7, %v2616_v18  ;;  %v3927_v9 = vpop.f32.mrb[66].mxu1 }
 0x2b0   :  { %v1865_v26 = vmul.f32 %v1776_v53, %v1202_v23  ;;  %v2881_v27 = vadd.f32 %v3927_v9, %v4986_v7  ;;  %v2619_v3 = vpop.f32.mrb[67].mxu1  ;;  %v2944_v28 = vmax.f32 %v2880_v14, 0.0  ;;  %v1801_v23 = vpop.permute.xlu0 %1800 }
 0x2b1   :  { %v2879_v33 = vadd.f32 %v4986_v7, %v2619_v3  ;;  %v2942_v30 = vmax.f32 %v2878_v19, 0.0  ;;  %v1806_v14 = vpop.permute.xlu1 %1805 }
 0x2b2   :  { %v2945_v29 = vmax.f32 %v2881_v27, 0.0  ;;  %v1900_v13 = vpack.c.bf16 %v1865_v26, %v1864_v22 }
 0x2b3   :  { %v2943_v40 = vmax.f32 %v2879_v33, 0.0  ;;  %v1206_v12 = vpop.f32.mrb[116].mxu0 }
 0x2b4   :  { %v3565_v34 = vpack.c.bf16 %v2945_v29, %v2944_v28  ;;  %v1207_v35 = vadd.f32 %v1206_v12, %v4947_v50  ;;  %v1208_v36 = vpop.f32.mrb[117].mxu0  ;;  %3980 = vmatprep.mubr.bf16.mxu1 %v1900_v13 }
 0x2b5   :  { %v3560_v16 = vpack.c.bf16 %v2943_v40, %v2942_v30  ;;  %v1209_v37 = vpop.f32.mrb[118].mxu0 }
 0x2b6   :  { %3717 = vst [vmem:[#allocation9 + $0x8] sm:$0xff] %v3565_v34   ;;  %v1210_v39 = vadd.f32 %v1209_v37, %v4949_v60  ;;  %v1211_v55 = vpop.f32.mrb[119].mxu0  ;;  %v1866_v44 = vmul.f32 %v1781_v25, %v1207_v35 }
 0x2b7   :  { %3561 = vst [vmem:[#allocation9] sm:$0xff] %v3560_v16  }
 0x2b8   :  { %v1867_v32 = vmul.f32 %v1786_v43, %v1210_v39 }
 0x2ba   :  { %v1901_v20 = vpack.c.bf16 %v1867_v32, %v1866_v44 }
 0x2bb   :  { %v1214_v45 = vpop.f32.mrb[120].mxu0 }
 0x2bc   :  { %v1215_v47 = vadd.f32 %v1214_v45, %v4951_v10  ;;  %v1216_v49 = vpop.f32.mrb[121].mxu0  ;;  %3981 = vmatmul.mubr.bf16.gmra.mrb[120].mxu1 %v1901_v20 }
 0x2bd   :  { %v1217_v50 = vpop.f32.mrb[122].mxu0  ;;  %v3930_v41 = vpop.f32.mrb[68].mxu1 }
 0x2be   :  { %v1218_v24 = vadd.f32 %v1217_v50, %v4953_v21  ;;  %v2884_v51 = vadd.f32 %v3930_v41, %v4986_v7  ;;  %v1219_v52 = vpop.f32.mrb[123].mxu0  ;;  %v2632_v60 = vpop.f32.mrb[69].mxu1  ;;  %v1868_v56 = vmul.f32 %v1791_v58, %v1215_v47 }
 0x2bf   :  { %v2882_v48 = vadd.f32 %v4986_v7, %v2632_v60  ;;  %v3931_v62 = vpop.f32.mrb[70].mxu1 }
 0x2c0   :  { %v1869_v0 = vmul.f32 %v1796_v54, %v1218_v24  ;;  %v2885_v59 = vadd.f32 %v3931_v62, %v4986_v7  ;;  %v2635_v61 = vpop.f32.mrb[71].mxu1  ;;  %v2948_v57 = vmax.f32 %v2884_v51, 0.0 }
 0x2c1   :  { %v2883_v10 = vadd.f32 %v4986_v7, %v2635_v61  ;;  %v2946_v38 = vmax.f32 %v2882_v48, 0.0 }
 0x2c2   :  { %v2949_v63 = vmax.f32 %v2885_v59, 0.0  ;;  %v1902_v2 = vpack.c.bf16 %v1869_v0, %v1868_v56 }
 0x2c3   :  { %v2947_v21 = vmax.f32 %v2883_v10, 0.0  ;;  %v1222_v1 = vpop.f32.mrb[124].mxu0 }
 0x2c4   :  { %v3575_v4 = vpack.c.bf16 %v2949_v63, %v2948_v57  ;;  %v1223_v5 = vadd.f32 %v1222_v1, %v4955_v31  ;;  %v1224_v8 = vpop.f32.mrb[125].mxu0  ;;  %3984 = vmatprep.mubr.bf16.mxu1 %v1902_v2 }
 0x2c5   :  { %v3570_v15 = vpack.c.bf16 %v2947_v21, %v2946_v38  ;;  %v1225_v11 = vpop.f32.mrb[126].mxu0 }
 0x2c6   :  { %3719 = vst [vmem:[#allocation9 + $0x18] sm:$0xff] %v3575_v4   ;;  %v1226_v46 = vadd.f32 %v1225_v11, %v4957_v42  ;;  %v1227_v6 = vpop.f32.mrb[127].mxu0  ;;  %v1870_v17 = vmul.f32 %v1801_v23, %v1223_v5 }
 0x2c7   :  { %3718 = vst [vmem:[#allocation9 + $0x10] sm:$0xff] %v3570_v15  }
 0x2c8   :  { %v1871_v18 = vmul.f32 %v1806_v14, %v1226_v46 }
 0x2ca   :  { %v1903_v53 = vpack.c.bf16 %v1871_v18, %v1870_v17 }
 0x2cc   :  { %3985 = vmatmul.mubr.bf16.gmra.mrb[124].mxu1 %v1903_v53 }
 0x2cd   :  { %v3934_v19 = vpop.f32.mrb[72].mxu1 }
 0x2ce   :  { %v2888_v9 = vadd.f32 %v3934_v19, %v4986_v7  ;;  %v2648_v22 = vpop.f32.mrb[73].mxu1 }
 0x2cf   :  { %v2886_v31 = vadd.f32 %v4986_v7, %v2648_v22  ;;  %v3935_v26 = vpop.f32.mrb[74].mxu1 }
 0x2d0   :  { %v2889_v27 = vadd.f32 %v3935_v26, %v4986_v7  ;;  %v2651_v3 = vpop.f32.mrb[75].mxu1  ;;  %v2952_v33 = vmax.f32 %v2888_v9, 0.0 }
 0x2d1   :  { %v2887_v42 = vadd.f32 %v4986_v7, %v2651_v3  ;;  %v2950_v29 = vmax.f32 %v2886_v31, 0.0 }
 0x2d2   :  { %v2953_v28 = vmax.f32 %v2889_v27, 0.0 }
 0x2d3   :  { %v2951_v13 = vmax.f32 %v2887_v42, 0.0 }
 0x2d4   :  { %v3585_v30 = vpack.c.bf16 %v2953_v28, %v2952_v33 }
 0x2d5   :  { %v3580_v40 = vpack.c.bf16 %v2951_v13, %v2950_v29 }
 0x2d6   :  { %3721 = vst [vmem:[#allocation9 + $0x28] sm:$0xff] %v3585_v30  }
 0x2d7   :  { %3720 = vst [vmem:[#allocation9 + $0x20] sm:$0xff] %v3580_v40  }
 0x2dd   :  { %v3938_v12 = vpop.f32.mrb[76].mxu1 }
 0x2de   :  { %v2892_v34 = vadd.f32 %v3938_v12, %v4986_v7  ;;  %v2664_v35 = vpop.f32.mrb[77].mxu1 }
 0x2df   :  { %v2890_v36 = vadd.f32 %v4986_v7, %v2664_v35  ;;  %v3939_v16 = vpop.f32.mrb[78].mxu1 }
 0x2e0   :  { %v2893_v37 = vadd.f32 %v3939_v16, %v4986_v7  ;;  %v2667_v25 = vpop.f32.mrb[79].mxu1  ;;  %v2956_v55 = vmax.f32 %v2892_v34, 0.0 }
 0x2e1   :  { %v2891_v39 = vadd.f32 %v4986_v7, %v2667_v25  ;;  %v2954_v44 = vmax.f32 %v2890_v36, 0.0 }
 0x2e2   :  { %v2957_v43 = vmax.f32 %v2893_v37, 0.0 }
 0x2e3   :  { %v2955_v32 = vmax.f32 %v2891_v39, 0.0 }
 0x2e4   :  { %v3595_v20 = vpack.c.bf16 %v2957_v43, %v2956_v55 }
 0x2e5   :  { %v3590_v45 = vpack.c.bf16 %v2955_v32, %v2954_v44 }
 0x2e6   :  { %3723 = vst [vmem:[#allocation9 + $0x38] sm:$0xff] %v3595_v20  }
 0x2e7   :  { %3722 = vst [vmem:[#allocation9 + $0x30] sm:$0xff] %v3590_v45  }
 0x2ed   :  { %v3942_v58 = vpop.f32.mrb[80].mxu1 }
 0x2ee   :  { %v2896_v47 = vadd.f32 %v3942_v58, %v4986_v7  ;;  %v2680_v49 = vpop.f32.mrb[81].mxu1 }
 0x2ef   :  { %v2894_v50 = vadd.f32 %v4986_v7, %v2680_v49  ;;  %v3943_v41 = vpop.f32.mrb[82].mxu1 }
 0x2f0   :  { %v2897_v24 = vadd.f32 %v3943_v41, %v4986_v7  ;;  %v2683_v51 = vpop.f32.mrb[83].mxu1  ;;  %v2960_v60 = vmax.f32 %v2896_v47, 0.0 }
 0x2f1   :  { %v2895_v52 = vadd.f32 %v4986_v7, %v2683_v51  ;;  %v2958_v48 = vmax.f32 %v2894_v50, 0.0 }
 0x2f2   :  { %v2961_v54 = vmax.f32 %v2897_v24, 0.0 }
 0x2f3   :  { %v2959_v62 = vmax.f32 %v2895_v52, 0.0 }
 0x2f4   :  { %v3605_v56 = vpack.c.bf16 %v2961_v54, %v2960_v60 }
 0x2f5   :  { %v3600_v0 = vpack.c.bf16 %v2959_v62, %v2958_v48 }
 0x2f6   :  { %3725 = vst [vmem:[#allocation9 + $0x48] sm:$0xff] %v3605_v56  }
 0x2f7   :  { %3724 = vst [vmem:[#allocation9 + $0x40] sm:$0xff] %v3600_v0  }
 0x2fd   :  { %v3946_v59 = vpop.f32.mrb[84].mxu1 }
 0x2fe   :  { %v2900_v61 = vadd.f32 %v3946_v59, %v4986_v7  ;;  %v2696_v10 = vpop.f32.mrb[85].mxu1 }
 0x2ff   :  { %v2898_v57 = vadd.f32 %v4986_v7, %v2696_v10  ;;  %v3947_v63 = vpop.f32.mrb[86].mxu1 }
 0x300   :  { %v2901_v2 = vadd.f32 %v3947_v63, %v4986_v7  ;;  %v2699_v38 = vpop.f32.mrb[87].mxu1  ;;  %v2964_v1 = vmax.f32 %v2900_v61, 0.0 }
 0x301   :  { %v2899_v21 = vadd.f32 %v4986_v7, %v2699_v38  ;;  %v2962_v5 = vmax.f32 %v2898_v57, 0.0 }
 0x302   :  { %v2965_v4 = vmax.f32 %v2901_v2, 0.0 }
 0x303   :  { %v2963_v8 = vmax.f32 %v2899_v21, 0.0 }
 0x304   :  { %v3615_v15 = vpack.c.bf16 %v2965_v4, %v2964_v1 }
 0x305   :  { %v3610_v11 = vpack.c.bf16 %v2963_v8, %v2962_v5 }
 0x306   :  { %3727 = vst [vmem:[#allocation9 + $0x58] sm:$0xff] %v3615_v15  }
 0x307   :  { %3726 = vst [vmem:[#allocation9 + $0x50] sm:$0xff] %v3610_v11  }
 0x30d   :  { %v3950_v46 = vpop.f32.mrb[88].mxu1 }
 0x30e   :  { %v2904_v6 = vadd.f32 %v3950_v46, %v4986_v7  ;;  %v2712_v23 = vpop.f32.mrb[89].mxu1 }
 0x30f   :  { %v2902_v14 = vadd.f32 %v4986_v7, %v2712_v23  ;;  %v3951_v17 = vpop.f32.mrb[90].mxu1 }
 0x310   :  { %v2905_v18 = vadd.f32 %v3951_v17, %v4986_v7  ;;  %v2715_v53 = vpop.f32.mrb[91].mxu1  ;;  %v2968_v9 = vmax.f32 %v2904_v6, 0.0 }
 0x311   :  { %v2903_v19 = vadd.f32 %v4986_v7, %v2715_v53  ;;  %v2966_v31 = vmax.f32 %v2902_v14, 0.0 }
 0x312   :  { %v2969_v22 = vmax.f32 %v2905_v18, 0.0 }
 0x313   :  { %v2967_v26 = vmax.f32 %v2903_v19, 0.0 }
 0x314   :  { %v3625_v27 = vpack.c.bf16 %v2969_v22, %v2968_v9 }
 0x315   :  { %v3620_v3 = vpack.c.bf16 %v2967_v26, %v2966_v31 }
 0x316   :  { %3729 = vst [vmem:[#allocation9 + $0x68] sm:$0xff] %v3625_v27  }
 0x317   :  { %3728 = vst [vmem:[#allocation9 + $0x60] sm:$0xff] %v3620_v3  }
 0x31d   :  { %v3954_v42 = vpop.f32.mrb[92].mxu1 }
 0x31e   :  { %v2908_v33 = vadd.f32 %v3954_v42, %v4986_v7  ;;  %v2728_v28 = vpop.f32.mrb[93].mxu1 }
 0x31f   :  { %v2906_v29 = vadd.f32 %v4986_v7, %v2728_v28  ;;  %v3955_v13 = vpop.f32.mrb[94].mxu1 }
 0x320   :  { %v2909_v30 = vadd.f32 %v3955_v13, %v4986_v7  ;;  %v2731_v40 = vpop.f32.mrb[95].mxu1  ;;  %v2972_v34 = vmax.f32 %v2908_v33, 0.0 }
 0x321   :  { %v2907_v12 = vadd.f32 %v4986_v7, %v2731_v40  ;;  %v2970_v36 = vmax.f32 %v2906_v29, 0.0 }
 0x322   :  { %v2973_v35 = vmax.f32 %v2909_v30, 0.0 }
 0x323   :  { %v2971_v16 = vmax.f32 %v2907_v12, 0.0 }
 0x324   :  { %v3635_v37 = vpack.c.bf16 %v2973_v35, %v2972_v34 }
 0x325   :  { %v3630_v25 = vpack.c.bf16 %v2971_v16, %v2970_v36 }
 0x326   :  { %3731 = vst [vmem:[#allocation9 + $0x78] sm:$0xff] %v3635_v37  }
 0x327   :  { %3730 = vst [vmem:[#allocation9 + $0x70] sm:$0xff] %v3630_v25  }
 0x32f   :  { %v3958_v39 = vpop.f32.mrb[96].mxu1 }
 0x330   :  { %v2912_v55 = vadd.f32 %v3958_v39, %v4986_v7  ;;  %v2744_v43 = vpop.f32.mrb[97].mxu1 }
 0x331   :  { %v2910_v44 = vadd.f32 %v4986_v7, %v2744_v43  ;;  %v3959_v32 = vpop.f32.mrb[98].mxu1 }
 0x332   :  { %v2913_v20 = vadd.f32 %v3959_v32, %v4986_v7  ;;  %v2747_v45 = vpop.f32.mrb[99].mxu1  ;;  %v2976_v47 = vmax.f32 %v2912_v55, 0.0 }
 0x333   :  { %v2911_v58 = vadd.f32 %v4986_v7, %v2747_v45  ;;  %v2974_v50 = vmax.f32 %v2910_v44, 0.0 }
 0x334   :  { %v2977_v49 = vmax.f32 %v2913_v20, 0.0 }
 0x335   :  { %v2975_v41 = vmax.f32 %v2911_v58, 0.0 }
 0x336   :  { %v3645_v24 = vpack.c.bf16 %v2977_v49, %v2976_v47 }
 0x337   :  { %v3640_v51 = vpack.c.bf16 %v2975_v41, %v2974_v50 }
 0x338   :  { %3733 = vst [vmem:[#allocation9 + $0x88] sm:$0xff] %v3645_v24  }
 0x339   :  { %3732 = vst [vmem:[#allocation9 + $0x80] sm:$0xff] %v3640_v51  }
 0x33f   :  { %v3962_v52 = vpop.f32.mrb[100].mxu1 }
 0x340   :  { %v2916_v60 = vadd.f32 %v3962_v52, %v4986_v7  ;;  %v2760_v54 = vpop.f32.mrb[101].mxu1 }
 0x341   :  { %v2914_v48 = vadd.f32 %v4986_v7, %v2760_v54  ;;  %v3963_v62 = vpop.f32.mrb[102].mxu1 }
 0x342   :  { %v2917_v56 = vadd.f32 %v3963_v62, %v4986_v7  ;;  %v2763_v0 = vpop.f32.mrb[103].mxu1  ;;  %v2980_v61 = vmax.f32 %v2916_v60, 0.0 }
 0x343   :  { %v2915_v59 = vadd.f32 %v4986_v7, %v2763_v0  ;;  %v2978_v57 = vmax.f32 %v2914_v48, 0.0 }
 0x344   :  { %v2981_v10 = vmax.f32 %v2917_v56, 0.0 }
 0x345   :  { %v2979_v63 = vmax.f32 %v2915_v59, 0.0 }
 0x346   :  { %v3655_v2 = vpack.c.bf16 %v2981_v10, %v2980_v61 }
 0x347   :  { %v3650_v38 = vpack.c.bf16 %v2979_v63, %v2978_v57 }
 0x348   :  { %3735 = vst [vmem:[#allocation9 + $0x98] sm:$0xff] %v3655_v2  }
 0x349   :  { %3734 = vst [vmem:[#allocation9 + $0x90] sm:$0xff] %v3650_v38  }
 0x34f   :  { %v3966_v21 = vpop.f32.mrb[104].mxu1 }
 0x350   :  { %v2920_v1 = vadd.f32 %v3966_v21, %v4986_v7  ;;  %v2776_v4 = vpop.f32.mrb[105].mxu1 }
 0x351   :  { %v2918_v5 = vadd.f32 %v4986_v7, %v2776_v4  ;;  %v3967_v8 = vpop.f32.mrb[106].mxu1 }
 0x352   :  { %v2921_v15 = vadd.f32 %v3967_v8, %v4986_v7  ;;  %v2779_v11 = vpop.f32.mrb[107].mxu1  ;;  %v2984_v6 = vmax.f32 %v2920_v1, 0.0 }
 0x353   :  { %v2919_v46 = vadd.f32 %v4986_v7, %v2779_v11  ;;  %v2982_v14 = vmax.f32 %v2918_v5, 0.0 }
 0x354   :  { %v2985_v23 = vmax.f32 %v2921_v15, 0.0 }
 0x355   :  { %v2983_v17 = vmax.f32 %v2919_v46, 0.0 }
 0x356   :  { %v3665_v18 = vpack.c.bf16 %v2985_v23, %v2984_v6 }
 0x357   :  { %v3660_v53 = vpack.c.bf16 %v2983_v17, %v2982_v14 }
 0x358   :  { %3737 = vst [vmem:[#allocation9 + $0xa8] sm:$0xff] %v3665_v18  }
 0x359   :  { %3736 = vst [vmem:[#allocation9 + $0xa0] sm:$0xff] %v3660_v53  }
 0x35f   :  { %v3970_v19 = vpop.f32.mrb[108].mxu1 }
 0x360   :  { %v2924_v9 = vadd.f32 %v3970_v19, %v4986_v7  ;;  %v2792_v22 = vpop.f32.mrb[109].mxu1 }
 0x361   :  { %v2922_v31 = vadd.f32 %v4986_v7, %v2792_v22  ;;  %v3971_v26 = vpop.f32.mrb[110].mxu1 }
 0x362   :  { %v2925_v27 = vadd.f32 %v3971_v26, %v4986_v7  ;;  %v2795_v3 = vpop.f32.mrb[111].mxu1  ;;  %v2988_v33 = vmax.f32 %v2924_v9, 0.0 }
 0x363   :  { %v2923_v42 = vadd.f32 %v4986_v7, %v2795_v3  ;;  %v2986_v29 = vmax.f32 %v2922_v31, 0.0 }
 0x364   :  { %v2989_v28 = vmax.f32 %v2925_v27, 0.0 }
 0x365   :  { %v2987_v13 = vmax.f32 %v2923_v42, 0.0 }
 0x366   :  { %v3675_v30 = vpack.c.bf16 %v2989_v28, %v2988_v33 }
 0x367   :  { %v3670_v40 = vpack.c.bf16 %v2987_v13, %v2986_v29 }
 0x368   :  { %3739 = vst [vmem:[#allocation9 + $0xb8] sm:$0xff] %v3675_v30  }
 0x369   :  { %3738 = vst [vmem:[#allocation9 + $0xb0] sm:$0xff] %v3670_v40  }
 0x36f   :  { %v3974_v12 = vpop.f32.mrb[112].mxu1 }
 0x370   :  { %v2928_v34 = vadd.f32 %v3974_v12, %v4986_v7  ;;  %v2808_v35 = vpop.f32.mrb[113].mxu1 }
 0x371   :  { %v2926_v36 = vadd.f32 %v4986_v7, %v2808_v35  ;;  %v3975_v16 = vpop.f32.mrb[114].mxu1 }
 0x372   :  { %v2929_v37 = vadd.f32 %v3975_v16, %v4986_v7  ;;  %v2811_v25 = vpop.f32.mrb[115].mxu1  ;;  %v2992_v55 = vmax.f32 %v2928_v34, 0.0 }
 0x373   :  { %v2927_v39 = vadd.f32 %v4986_v7, %v2811_v25  ;;  %v2990_v44 = vmax.f32 %v2926_v36, 0.0 }
 0x374   :  { %v2993_v43 = vmax.f32 %v2929_v37, 0.0 }
 0x375   :  { %v2991_v32 = vmax.f32 %v2927_v39, 0.0 }
 0x376   :  { %v3685_v20 = vpack.c.bf16 %v2993_v43, %v2992_v55 }
 0x377   :  { %v3680_v45 = vpack.c.bf16 %v2991_v32, %v2990_v44 }
 0x378   :  { %3741 = vst [vmem:[#allocation9 + $0xc8] sm:$0xff] %v3685_v20  }
 0x379   :  { %3740 = vst [vmem:[#allocation9 + $0xc0] sm:$0xff] %v3680_v45  }
 0x37f   :  { %v3978_v58 = vpop.f32.mrb[116].mxu1 }
 0x380   :  { %v2932_v47 = vadd.f32 %v3978_v58, %v4986_v7  ;;  %v2824_v49 = vpop.f32.mrb[117].mxu1 }
 0x381   :  { %v2930_v50 = vadd.f32 %v4986_v7, %v2824_v49  ;;  %v3979_v41 = vpop.f32.mrb[118].mxu1 }
 0x382   :  { %v2933_v24 = vadd.f32 %v3979_v41, %v4986_v7  ;;  %v2827_v51 = vpop.f32.mrb[119].mxu1  ;;  %v2996_v60 = vmax.f32 %v2932_v47, 0.0 }
 0x383   :  { %v2931_v52 = vadd.f32 %v4986_v7, %v2827_v51  ;;  %v2994_v48 = vmax.f32 %v2930_v50, 0.0 }
 0x384   :  { %v2997_v54 = vmax.f32 %v2933_v24, 0.0 }
 0x385   :  { %v2995_v62 = vmax.f32 %v2931_v52, 0.0 }
 0x386   :  { %v3695_v56 = vpack.c.bf16 %v2997_v54, %v2996_v60 }
 0x387   :  { %v3690_v0 = vpack.c.bf16 %v2995_v62, %v2994_v48 }
 0x388   :  { %3743 = vst [vmem:[#allocation9 + $0xd8] sm:$0xff] %v3695_v56  }
 0x389   :  { %3742 = vst [vmem:[#allocation9 + $0xd0] sm:$0xff] %v3690_v0  }
 0x38f   :  { %v3982_v59 = vpop.f32.mrb[120].mxu1 }
 0x390   :  { %v2936_v61 = vadd.f32 %v3982_v59, %v4986_v7  ;;  %v2840_v10 = vpop.f32.mrb[121].mxu1 }
 0x391   :  { %v2934_v57 = vadd.f32 %v4986_v7, %v2840_v10  ;;  %v3983_v63 = vpop.f32.mrb[122].mxu1 }
 0x392   :  { %v2937_v2 = vadd.f32 %v3983_v63, %v4986_v7  ;;  %v2843_v38 = vpop.f32.mrb[123].mxu1  ;;  %v3000_v1 = vmax.f32 %v2936_v61, 0.0 }
 0x393   :  { %v2935_v21 = vadd.f32 %v4986_v7, %v2843_v38  ;;  %v2998_v5 = vmax.f32 %v2934_v57, 0.0 }
 0x394   :  { %v3001_v4 = vmax.f32 %v2937_v2, 0.0 }
 0x395   :  { %v2999_v8 = vmax.f32 %v2935_v21, 0.0 }
 0x396   :  { %v3705_v15 = vpack.c.bf16 %v3001_v4, %v3000_v1 }
 0x397   :  { %v3700_v11 = vpack.c.bf16 %v2999_v8, %v2998_v5 }
 0x398   :  { %3745 = vst [vmem:[#allocation9 + $0xe8] sm:$0xff] %v3705_v15  }
 0x399   :  { %3744 = vst [vmem:[#allocation9 + $0xe0] sm:$0xff] %v3700_v11  }
 0x39f   :  { %v3986_v46 = vpop.f32.mrb[124].mxu1 }
 0x3a0   :  { %v2940_v6 = vadd.f32 %v3986_v46, %v4986_v7  ;;  %v2856_v23 = vpop.f32.mrb[125].mxu1 }
 0x3a1   :  { %v2938_v14 = vadd.f32 %v4986_v7, %v2856_v23  ;;  %v3987_v17 = vpop.f32.mrb[126].mxu1 }
 0x3a2   :  { %v2941_v18 = vadd.f32 %v3987_v17, %v4986_v7  ;;  %v2859_v53 = vpop.f32.mrb[127].mxu1  ;;  %v3004_v9 = vmax.f32 %v2940_v6, 0.0 }
 0x3a3   :  { %v2939_v19 = vadd.f32 %v4986_v7, %v2859_v53  ;;  %v3002_v31 = vmax.f32 %v2938_v14, 0.0 }
 0x3a4   :  { %v3005_v22 = vmax.f32 %v2941_v18, 0.0 }
 0x3a5   :  { %v3003_v26 = vmax.f32 %v2939_v19, 0.0 }
 0x3a6   :  { %v3715_v27 = vpack.c.bf16 %v3005_v22, %v3004_v9 }
 0x3a7   :  { %v3710_v3 = vpack.c.bf16 %v3003_v26, %v3002_v31 }
 0x3a8   :  { %3747 = vst [vmem:[#allocation9 + $0xf8] sm:$0xff] %v3715_v27  }
 0x3a9   :  { %3746 = vst [vmem:[#allocation9 + $0xf0] sm:$0xff] %v3710_v3  }
 0x3aa   :  { %4346 = shalt.err (!%p4343_p0)
}
 0x3ab   :  { %s4347_s19 = scalar_lea.hbm %s5081_s6, 4096 }
 0x3ac   :  { %p4348_p1 = scmp.ne.s32.totalorder %s5081_s6, %s4347_s19  ;;  %p4351_p2 = scmp.lt.u32.totalorder %s4347_s19, %s5081_s6 }
 0x3ae   :  { %p4353_p3 = pnand %p4351_p2, %p4348_p1 }
 0x3b0   :  { %4356 = shalt.err (!%p4353_p3)
}
 0x3b1   :  { %3337 = dma.vmem_to_hbm [thread:$0]  %s3332_s15, 4096, %s5081_s6, [#allocation5], %s4365_s9, %s4365_s9, %s4366_s10  }
 0x3b2   :  { %4361 = dma.done.wait [#allocation5], 4096  }
 0x3b3   :  { %4362 = vsyncadd [#allocation5], 4294963200 }
 0x3b4   :  { %3341 = vsyncpa [#allocation4], 1 }
 0x3b5   :  { %3342 = vsyncpa [#allocation7], 1 }
 0x3b6   :  { %3343 = vsyncpa [#allocation5], 1 }

</bundles_post_ra>
